<compile_context>
chip_gen: v6e
topology: v6e:2x2x1
jax: 0.10.0
libtpu: 0.0.40
codegen_flags: <defaults>
</compile_context>

<pallas_src>
import functools

import jax
import jax.numpy as jnp
from jax import lax
from jax.experimental import pallas as pl
from jax.experimental.pallas import tpu as pltpu

_QKPAD_MIN = 8  # pad the C//16 query/key channels up to a full sublane group


def _self_attention_kernel(x_full_ref, x_q_ref, w_ref, b_ref, gamma_ref,
                           o_ref, qkv_ref, qt_ref):
    """One (batch, query-tile) grid step.

    x_full_ref: (C, N)       whole image: channels in sublanes, pixels in lanes
    x_q_ref:    (C, TQ)      query-tile slice of the same image (for the residual add)
    w_ref:      (CP, C)      fused [Wq; Wk; Wv] 1x1-conv weights (Q/K zero-padded rows)
    b_ref:      (CP, 1)      fused biases
    gamma_ref:  (1,)         SMEM scalar residual gate
    o_ref:      (C, TQ)      output tile (lane-dense store)
    qkv_ref:    (CP, N) f32  scratch: fused projection for the current batch element
    qt_ref:     (N, QKPAD)   scratch: Q with query positions in the sublane dim
    """
    C, TQ = o_ref.shape
    qkpad = (w_ref.shape[0] - C) // 2
    q_idx = pl.program_id(1)

    @pl.when(q_idx == 0)
    def _():
        # Fused Q/K/V projection, computed once per batch element (the query-tile axis
        # is "arbitrary", so this scratch is valid for all subsequent tiles of this b).
        qkv = jnp.dot(w_ref[...], x_full_ref[...],
                      preferred_element_type=jnp.float32) + b_ref[...]
        qkv_ref[...] = qkv
        # Keep Q with query positions in sublanes so the energy matmul below is a
        # canonical (TQ, qkpad) @ (qkpad, N) MXU call (same pattern as kbuf[slot].T).
        qt_ref[...] = qkv[0:qkpad, :].T

    col0 = pl.multiple_of(q_idx * TQ, TQ)
    q_rows = qt_ref[pl.ds(col0, TQ), :]               # (TQ, qkpad)
    k_t = qkv_ref[qkpad:2 * qkpad, :]                 # (qkpad, N)  padded rows are zero
    v_t = qkv_ref[2 * qkpad:2 * qkpad + C, :]         # (C, N)

    # energy[i, j] = q_i . k_j  (zero-padded q/k rows contribute exactly 0)
    energy = jnp.dot(q_rows, k_t, preferred_element_type=jnp.float32)   # (TQ, N)

    # Numerically stable softmax over keys (the lane dimension).
    m = jnp.max(energy, axis=-1, keepdims=True)
    p = jnp.exp(energy - m)
    s = jnp.sum(p, axis=-1, keepdims=True)
    attn = p / s                                                        # (TQ, N)

    # out[c, i] = sum_j v[c, j] * attn[i, j] -- contraction over all N keys (MXU-friendly),
    # lane-dense (C, TQ) result.
    out_t = lax.dot_general(v_t, attn, (((1,), (1,)), ((), ())),
                            preferred_element_type=jnp.float32)         # (C, TQ)

    o_ref[...] = (gamma_ref[0] * out_t
                  + x_q_ref[...].astype(jnp.float32)).astype(o_ref.dtype)


def _pick_query_tile(n):
    for t in (512, 256, 128):
        if n % t == 0:
            return t
    return n  # fall back to a single full-width tile (block == full dim is always legal)


@jax.jit
def self_attention(x, wq, bq, wk, bk, wv, bv, gamma):
    """Equivalent of PyTorch Self_Attention.forward.

    x:  (B, C, H, W)          (C == in_dim, must be a multiple of 8 and >= 16)
    wq: (C//16, C, 1, 1), bq: (C//16,)
    wk: (C//16, C, 1, 1), bk: (C//16,)
    wv: (C, C, 1, 1),     bv: (C,)
    gamma: scalar
    returns (B, C, H, W)
    """
    B, C, H, W = x.shape
    N = H * W
    Cqk = wq.shape[0]
    assert C % 8 == 0, "channel count must be a multiple of 8 for this kernel layout"
    assert Cqk >= 1

    qkpad = max(_QKPAD_MIN, ((Cqk + 7) // 8) * 8)
    CP = 2 * qkpad + C

    # Fuse the three 1x1-conv weight matrices into a single (CP, C) matrix; Q and K
    # blocks are zero-padded to `qkpad` sublanes each so in-kernel slices stay aligned.
    wq2 = wq.reshape(Cqk, C).astype(jnp.float32)
    wk2 = wk.reshape(Cqk, C).astype(jnp.float32)
    wv2 = wv.reshape(C, C).astype(jnp.float32)
    w_all = jnp.zeros((CP, C), jnp.float32)
    w_all = w_all.at[0:Cqk].set(wq2)
    w_all = w_all.at[qkpad:qkpad + Cqk].set(wk2)
    w_all = w_all.at[2 * qkpad:].set(wv2)

    b_all = jnp.zeros((CP, 1), jnp.float32)
    b_all = b_all.at[0:Cqk, 0].set(bq.astype(jnp.float32))
    b_all = b_all.at[qkpad:qkpad + Cqk, 0].set(bk.astype(jnp.float32))
    b_all = b_all.at[2 * qkpad:, 0].set(bv.astype(jnp.float32))

    gamma_arr = jnp.asarray(gamma, jnp.float32).reshape(1)

    x3 = x.reshape(B, C, N)   # pure reshape: no transpose, no extra HBM pass
    TQ = _pick_query_tile(N)
    nq = N // TQ

    flops = B * (2 * CP * C * N + 2 * qkpad * N * N + 2 * C * N * N)
    bytes_accessed = 4 * (3 * B * C * N + CP * C + CP + 1)
    cost = pl.CostEstimate(flops=flops, transcendentals=B * N * N,
                           bytes_accessed=bytes_accessed)

    out3 = pl.pallas_call(
        _self_attention_kernel,
        out_shape=jax.ShapeDtypeStruct((B, C, N), x.dtype),
        grid_spec=pltpu.PrefetchScalarGridSpec(
            num_scalar_prefetch=0,
            grid=(B, nq),
            in_specs=[
                pl.BlockSpec((None, C, N), lambda b, q: (b, 0, 0)),   # full image (K/V)
                pl.BlockSpec((None, C, TQ), lambda b, q: (b, 0, q)),  # query tile (residual)
                pl.BlockSpec((CP, C), lambda b, q: (0, 0)),           # fused weights
                pl.BlockSpec((CP, 1), lambda b, q: (0, 0)),           # fused biases
                pl.BlockSpec(memory_space=pltpu.MemorySpace.SMEM),    # gamma scalar
            ],
            out_specs=pl.BlockSpec((None, C, TQ), lambda b, q: (b, 0, q)),
            scratch_shapes=[
                pltpu.VMEM((CP, N), jnp.float32),      # fused QKV projection
                pltpu.VMEM((N, qkpad), jnp.float32),   # Q with queries in sublanes
            ],
        ),
        compiler_params=pltpu.CompilerParams(
            dimension_semantics=("parallel", "arbitrary")),
        cost_estimate=cost,
    )(x3, x3, w_all, b_all, gamma_arr)

    return out3.reshape(B, C, H, W)


def _reference(x, wq, bq, wk, bk, wv, bv, gamma):
    """Pure-JAX reference matching the PyTorch module exactly (for verification)."""
    B, C, H, W = x.shape
    N = H * W
    xf = x.reshape(B, C, N)
    q = jnp.einsum("oc,bcn->bon", wq.reshape(-1, C), xf) + bq[None, :, None]
    k = jnp.einsum("oc,bcn->bon", wk.reshape(-1, C), xf) + bk[None, :, None]
    v = jnp.einsum("oc,bcn->bon", wv.reshape(-1, C), xf) + bv[None, :, None]
    energy = jnp.einsum("bci,bcj->bij", q, k)          # (B, N, N): q_i . k_j
    attn = jax.nn.softmax(energy, axis=-1)             # softmax over keys j
    out = jnp.einsum("bcj,bij->bci", v, attn)          # (B, C, N)
    out = gamma * out + xf
    return out.reshape(B, C, H, W)


if __name__ == "__main__":
    key = jax.random.PRNGKey(0)
    ks = jax.random.split(key, 7)

    B, C, H, W = 2, 32, 16, 16          # in_dim=32 -> query/key channels = 32 // 16 = 2
    Cqk = C // 16

    x = jax.random.normal(ks[0], (B, C, H, W), jnp.float32)
    wq = jax.random.normal(ks[1], (Cqk, C, 1, 1), jnp.float32) * 0.1
    bq = jax.random.normal(ks[2], (Cqk,), jnp.float32) * 0.1
    wk = jax.random.normal(ks[3], (Cqk, C, 1, 1), jnp.float32) * 0.1
    bk = jax.random.normal(ks[4], (Cqk,), jnp.float32) * 0.1
    wv = jax.random.normal(ks[5], (C, C, 1, 1), jnp.float32) * 0.1
    bv = jax.random.normal(ks[6], (C,), jnp.float32) * 0.1
    # PyTorch initializes gamma to 0 (pure residual); use a nonzero value so the
    # attention path is actually exercised by the check, then also verify the gamma=0 case.
    gamma = jnp.float32(0.7)

    out = self_attention(x, wq, bq, wk, bk, wv, bv, gamma)
    out = jax.block_until_ready(out)

    ref = _reference(x, wq, bq, wk, bk, wv, bv, gamma)
    assert out.shape == (B, C, H, W), out.shape
    max_err = float(jnp.abs(out - ref).max())
    assert jnp.allclose(out, ref, atol=1e-4, rtol=1e-4), max_err

    out0 = self_attention(x, wq, bq, wk, bk, wv, bv, jnp.float32(0.0))
    out0 = jax.block_until_ready(out0)
    assert jnp.allclose(out0, x, atol=1e-6), float(jnp.abs(out0 - x).max())

    print("KERNEL_OK")
</pallas_src>

<mosaic_0001>
module attributes {stable_mosaic.version = 11 : i64} {
  func.func @_self_attention_kernel(%arg0: i32, %arg1: i32, %arg2: memref<1x32x256xf32, #tpu.memory_space<vmem>>, %arg3: memref<1x32x256xf32, #tpu.memory_space<vmem>>, %arg4: memref<48x32xf32, #tpu.memory_space<vmem>>, %arg5: memref<48x1xf32, #tpu.memory_space<vmem>>, %arg6: memref<1xf32, #tpu.memory_space<smem>>, %arg7: memref<1x32x256xf32, #tpu.memory_space<vmem>>, %arg8: memref<48x256xf32, #tpu.memory_space<vmem>>, %arg9: memref<256x8xf32, #tpu.memory_space<vmem>>) attributes {dimension_semantics = [#tpu.dimension_semantics<parallel>, #tpu.dimension_semantics<arbitrary>], iteration_bounds = array<i64: 2, 1>, scalar_prefetch = 0 : i64, scratch_operands = 2 : i64, tpu.core_type = #tpu.core_type<tc>, window_params = [{transform_indices = @transform_0, window_bounds = array<i64: 1, 32, 256>}, {transform_indices = @transform_1, window_bounds = array<i64: 1, 32, 256>}, {pipeline_mode = #tpu.pipeline_mode<synchronous>, transform_indices = @transform_2, window_bounds = array<i64: 48, 32>}, {pipeline_mode = #tpu.pipeline_mode<synchronous>, transform_indices = @transform_3, window_bounds = array<i64: 48, 1>}, {transform_indices = @transform_4, window_bounds = array<i64: 1>}, {transform_indices = @transform_5, window_bounds = array<i64: 1, 32, 256>}]} {
    %c0_i32 = arith.constant 0 : i32
    %0 = arith.cmpi eq, %arg1, %c0_i32 : i32
    %1 = arith.extui %0 : i1 to i32
    %c0_i32_0 = arith.constant 0 : i32
    %2 = arith.cmpi ne, %1, %c0_i32_0 : i32
    scf.if %2 {
      %c0_13 = arith.constant 0 : index
      %c0_14 = arith.constant 0 : index
      %29 = vector.load %arg4[%c0_13, %c0_14] : memref<48x32xf32, #tpu.memory_space<vmem>>, vector<48x32xf32>
      %c0_15 = arith.constant 0 : index
      %c0_16 = arith.constant 0 : index
      %c0_17 = arith.constant 0 : index
      %30 = vector.load %arg2[%c0_15, %c0_16, %c0_17] : memref<1x32x256xf32, #tpu.memory_space<vmem>>, vector<1x32x256xf32>
      %31 = vector.shape_cast %30 : vector<1x32x256xf32> to vector<32x256xf32>
      %cst_18 = arith.constant dense<0.000000e+00> : vector<48x256xf32>
      %32 = tpu.matmul %29, %31, %cst_18 {dimension_numbers = #tpu.dot_dimension_numbers<[1], [0], [0], [1], [0, 0, 1, 1], [], []>} : vector<48x32xf32>, vector<32x256xf32>, vector<48x256xf32> -> vector<48x256xf32>
      %c0_19 = arith.constant 0 : index
      %c0_20 = arith.constant 0 : index
      %33 = vector.load %arg5[%c0_19, %c0_20] : memref<48x1xf32, #tpu.memory_space<vmem>>, vector<48x1xf32>
      %34 = vector.broadcast %33 : vector<48x1xf32> to vector<48x256xf32>
      %35 = arith.addf %32, %34 : vector<48x256xf32>
      %c0_21 = arith.constant 0 : index
      %c0_22 = arith.constant 0 : index
      %36 = vector.load %arg8[%c0_21, %c0_22] : memref<48x256xf32, #tpu.memory_space<vmem>>, vector<48x256xf32>
      tpu.vector_store %arg8[%c0_21, %c0_22], %35 {strides = array<i32>} : memref<48x256xf32, #tpu.memory_space<vmem>>, vector<48x256xf32>,
      %37 = vector.extract_strided_slice %35 {offsets = [0, 0], sizes = [8, 256], strides = [1, 1]} : vector<48x256xf32> to vector<8x256xf32>
      %38 = tpu.transpose %37, [1, 0] : vector<8x256xf32> -> vector<256x8xf32>
      %c0_23 = arith.constant 0 : index
      %c0_24 = arith.constant 0 : index
      %39 = vector.load %arg9[%c0_23, %c0_24] : memref<256x8xf32, #tpu.memory_space<vmem>>, vector<256x8xf32>
      tpu.vector_store %arg9[%c0_23, %c0_24], %38 {strides = array<i32>} : memref<256x8xf32, #tpu.memory_space<vmem>>, vector<256x8xf32>,
    } else {
    }
    %c256_i32 = arith.constant 256 : i32
    %3 = arith.muli %arg1, %c256_i32 : i32
    %4 = tpu.assume_multiple %3, 256 : i32
    %5 = arith.index_cast %4 : i32 to index
    %c0 = arith.constant 0 : index
    %6 = vector.load %arg9[%5, %c0] : memref<256x8xf32, #tpu.memory_space<vmem>>, vector<256x8xf32>
    %c8 = arith.constant 8 : index
    %c0_1 = arith.constant 0 : index
    %7 = vector.load %arg8[%c8, %c0_1] : memref<48x256xf32, #tpu.memory_space<vmem>>, vector<8x256xf32>
    %c16 = arith.constant 16 : index
    %c0_2 = arith.constant 0 : index
    %8 = vector.load %arg8[%c16, %c0_2] : memref<48x256xf32, #tpu.memory_space<vmem>>, vector<32x256xf32>
    %cst = arith.constant dense<0.000000e+00> : vector<256x256xf32>
    %9 = tpu.matmul %6, %7, %cst {dimension_numbers = #tpu.dot_dimension_numbers<[1], [0], [0], [1], [0, 0, 1, 1], [], []>} : vector<256x8xf32>, vector<8x256xf32>, vector<256x256xf32> -> vector<256x256xf32>
    %cst_3 = arith.constant dense<0xFF800000> : vector<256xf32>
    %10 = vector.multi_reduction <maximumf>, %9, %cst_3 [1] : vector<256x256xf32> to vector<256xf32>
    %11 = vector.shape_cast %10 : vector<256xf32> to vector<256x1xf32>
    %12 = vector.broadcast %11 : vector<256x1xf32> to vector<256x256xf32>
    %13 = arith.subf %9, %12 : vector<256x256xf32>
    %14 = math.exp %13 : vector<256x256xf32>
    %cst_4 = arith.constant dense<0.000000e+00> : vector<256xf32>
    %15 = vector.multi_reduction <add>, %14, %cst_4 [1] : vector<256x256xf32> to vector<256xf32>
    %16 = vector.shape_cast %15 : vector<256xf32> to vector<256x1xf32>
    %17 = vector.broadcast %16 : vector<256x1xf32> to vector<256x256xf32>
    %18 = arith.divf %14, %17 : vector<256x256xf32>
    %cst_5 = arith.constant dense<0.000000e+00> : vector<32x256xf32>
    %19 = tpu.matmul %8, %18, %cst_5 {dimension_numbers = #tpu.dot_dimension_numbers<[1], [1], [0], [0], [0, 0, 1, 0], [], []>} : vector<32x256xf32>, vector<256x256xf32>, vector<32x256xf32> -> vector<32x256xf32>
    %c0_6 = arith.constant 0 : index
    %20 = memref.load %arg6[%c0_6] : memref<1xf32, #tpu.memory_space<smem>>
    %21 = vector.broadcast %20 : f32 to vector<32x256xf32>
    %22 = arith.mulf %21, %19 : vector<32x256xf32>
    %c0_7 = arith.constant 0 : index
    %c0_8 = arith.constant 0 : index
    %c0_9 = arith.constant 0 : index
    %23 = vector.load %arg3[%c0_7, %c0_8, %c0_9] : memref<1x32x256xf32, #tpu.memory_space<vmem>>, vector<1x32x256xf32>
    %24 = vector.shape_cast %23 : vector<1x32x256xf32> to vector<32x256xf32>
    %25 = arith.addf %22, %24 : vector<32x256xf32>
    %c0_10 = arith.constant 0 : index
    %c0_11 = arith.constant 0 : index
    %c0_12 = arith.constant 0 : index
    %26 = vector.load %arg7[%c0_10, %c0_11, %c0_12] : memref<1x32x256xf32, #tpu.memory_space<vmem>>, vector<1x32x256xf32>
    %27 = vector.shape_cast %26 : vector<1x32x256xf32> to vector<32x256xf32>
    %28 = vector.shape_cast %25 : vector<32x256xf32> to vector<1x32x256xf32>
    tpu.vector_store %arg7[%c0_10, %c0_11, %c0_12], %28 {strides = array<i32>} : memref<1x32x256xf32, #tpu.memory_space<vmem>>, vector<1x32x256xf32>,
    return
  }
  func.func @transform_0(%arg0: i32, %arg1: i32) -> (i32, i32, i32) {
    %c0_i32 = arith.constant 0 : i32
    %c0_i32_0 = arith.constant 0 : i32
    %c0_i32_1 = arith.constant 0 : i32
    return %arg0, %c0_i32, %c0_i32_0 : i32, i32, i32
  }
  func.func @transform_1(%arg0: i32, %arg1: i32) -> (i32, i32, i32) {
    %c0_i32 = arith.constant 0 : i32
    %c0_i32_0 = arith.constant 0 : i32
    return %arg0, %c0_i32, %arg1 : i32, i32, i32
  }
  func.func @transform_2(%arg0: i32, %arg1: i32) -> (i32, i32) {
    %c0_i32 = arith.constant 0 : i32
    %c0_i32_0 = arith.constant 0 : i32
    %c0_i32_1 = arith.constant 0 : i32
    return %c0_i32, %c0_i32_0 : i32, i32
  }
  func.func @transform_3(%arg0: i32, %arg1: i32) -> (i32, i32) {
    %c0_i32 = arith.constant 0 : i32
    %c0_i32_0 = arith.constant 0 : i32
    %c0_i32_1 = arith.constant 0 : i32
    return %c0_i32, %c0_i32_0 : i32, i32
  }
  func.func @transform_4(%arg0: i32, %arg1: i32) -> i32 {
    %c0_i32 = arith.constant 0 : i32
    %c0_i32_0 = arith.constant 0 : i32
    return %c0_i32 : i32
  }
  func.func @transform_5(%arg0: i32, %arg1: i32) -> (i32, i32, i32) {
    %c0_i32 = arith.constant 0 : i32
    %c0_i32_0 = arith.constant 0 : i32
    return %arg0, %c0_i32, %arg1 : i32, i32, i32
  }
}

</mosaic_0001>

<bundles_post_ra>
// kernel: self_attention.1
= control target key start
LH: loop header
LB: loop body
LE: loop exit
PB: predicated region body
PF: predicated region fallthrough
CT: control target
= control target key end

     0   :  { %s2067_s20 = smov 0   ;;  %s2069_s21 = smov 0   ;;  %s2794_s0 = inlined_call_operand.vmem [shape: f32[2,32,256], index: 0, kind: input, shape index: {}, may-alias: {0,1}]   ;;  %s2795_s1 = inlined_call_operand.vmem [shape: f32[2,32,256], index: 1, kind: input, shape index: {}, may-alias: {0,1}]   ;;  %s2796_s2 = inlined_call_operand.vmem [shape: f32[48,32], index: 2, kind: input, shape index: {}]   ;;  %s2797_s3 = inlined_call_operand.vmem [shape: f32[48,1], index: 3, kind: input, shape index: {}]   ;;  %s2798_s4 = inlined_call_operand.<no memory space> [shape: f32[1], index: 4, kind: input, shape index: {}]   ;;  %s2799_s5 = inlined_call_operand.vmem [shape: f32[2,32,256], index: 5, kind: output, shape index: {}]  }
   0x1   :  { %10 = sst [smem:[#allocation4]] %s2798_s4  ;;  %s2071_s22 = smov 0  }
   0x2 LB: > { %s28_s4 = sadd.s32 1, %s2026_s21  ;;  %p1674_p0 = scmp.ge.s32.totalorder %s2030_s22, 1  ;;  %s2030_s22 = sphi %s2071_s22, %s16_s22   ;;  %s2026_s21 = sphi %s2069_s21, %s2891_s21   ;;  %s2022_s20 = sphi %s2067_s20, %s2890_s20  }
   0x3   : > { %p30_p1 = scmp.ge.s32.totalorder %s28_s4, 2  ;;  %p219_p2 = scmp.lt.s32.totalorder %s2030_s22, 3 }
   0x5   : > { %s2893_s4 = smov (%p30_p1, %s28_s4), 0  ;;  %p220_p3 = pnand %p1674_p0, %p219_p2 }
   0x7   : > { %223 = sbr.rel (%p220_p3) target bundleno = 1327 (0x52f), region = 40 }
   0xc   : > { %p260_p4 = scmp.lt.s32.totalorder %s2022_s20, 1  ;;  %v2800_v0 = vmov 0.0   ;;  %v2033_v1 = vmov 0   ;;  %v303_v2 = vld [vmem:[%s2797_s3] sm:$0xff]  ;;  %v304_v3 = vld [vmem:[%s2797_s3 + $0x8] sm:$0xff]  ;;  %vm339_vm0 = vcmask 261120  }
   0xd   : > { %422 = vmatprep.mubr.f32.mxu0 %v2800_v0  ;;  %1814 = vset.pattern.permute.xlu0 %v2033_v1  ;;  %v289_v12 = vld [vmem:[%s2796_s2] sm:$0xff]  ;;  %v290_v13 = vld [vmem:[%s2796_s2 + $0x8] sm:$0xff]  ;;  %vm535_vm1 = vcmask 64512   ;;  %s1535_s29 = sld [smem:[#allocation4]] }
   0xe   : > { %s2895_s20 = smov (!%p260_p4, %s2022_s20), 1  ;;  %311 = vperm.xlu0 %1814, %v303_v2   ;;  %773 = vmatprep.mubr.f32.mxu1 %v2800_v0 }
   0xf   : > { %s2093_s27 = sshll.u32 %s2895_s20, 6 }
  0x10   : > { %s264_s30 = scalar_lea.vmem %s2794_s0, %s2093_s27  ;;  %s2761_s7 = scalar_lea.vmem %s2795_s1, %s2093_s27 }
  0x11   : > { %v302_v4 = vld [vmem:[%s264_s30 + $0x38] sm:$0xff]  ;;  %v301_v5 = vld [vmem:[%s264_s30 + $0x30] sm:$0xff]  ;;  %v300_v6 = vld [vmem:[%s264_s30 + $0x28] sm:$0xff]  ;;  %s2769_s10 = scalar_lea.vmem %s2799_s5, %s2093_s27 }
  0x12   : > { %316 = vperm.xlu0 %1814, %v304_v3   ;;  %382 = vmatprep.subr.mxu0 %v302_v4  ;;  %v299_v7 = vld [vmem:[%s264_s30 + $0x20] sm:$0xff]  ;;  %v298_v8 = vld [vmem:[%s264_s30 + $0x18] sm:$0xff]  ;;  %v297_v9 = vld [vmem:[%s264_s30 + $0x10] sm:$0xff] }
  0x13   : > { %383 = vmatpush1.msra.mxu0 %v301_v5  ;;  %v296_v10 = vld [vmem:[%s264_s30 + $0x8] sm:$0xff]  ;;  %v295_v11 = vld [vmem:[%s264_s30] sm:$0xff] }
  0x14   : > { %384 = vmatprep.subr.mxu0 %v300_v6 }
  0x15   : > { %385 = vmatpush1.msra.mxu0 %v299_v7 }
  0x16   : > { %386 = vmatprep.subr.mxu0 %v298_v8 }
  0x17   : > { %387 = vmatpush1.msra.mxu0 %v297_v9 }
  0x18   : > { %388 = vmatprep.subr.mxu0 %v296_v10 }
  0x19   : > { %389 = vmatpush1.msra.mxu0 %v295_v11 }
  0x1a   : > { %1681 = vmatmul.mubr.msk.f32.vlgmr.msra.gmra.mxu0 %vm339_vm0, %v289_v12 }
  0x1b   : > { %428 = vmatprep.mubr.f32.mxu0 %v2800_v0 }
  0x1e   : > { %1682 = vmatmul.mubr.msk.f32.gmra.mxu0 %vm339_vm0, %v290_v13 }
  0x1f   : > { %434 = vmatprep.mubr.f32.mxu0 %v2800_v0 }
  0x89   : > { %v312_v14 = vpop.permute.xlu0 %311 }
  0x8d   : > { %v317_v19 = vpop.permute.xlu0 %316 }
  0xda   : > { %v424_v15 = vpop.f32.mrf.mxu0 }
  0xdb   : > { %v425_v16 = vadd.f32 %v424_v15, %v312_v14 }
  0xdc   : > { %v426_v17 = vpop.f32.mrf.mxu0 }
  0xdd   : > { %471 = vxpose.xlu1.b32.start.end [1/1] (short) %v425_v16, 128  ;;  %v427_v23 = vadd.f32 %v426_v17, %v312_v14 }
  0xde   : > { %v430_v18 = vpop.f32.mrf.mxu0 }
  0xdf   : > { %v431_v22 = vadd.f32 %v430_v18, %v317_v19 }
  0xe0   : > { %v432_v20 = vpop.f32.mrf.mxu0 }
  0xe1   : > { %v433_v21 = vadd.f32 %v432_v20, %v317_v19 }
  0xe3   : > { %739 = vmatprep.subr.mxu1 %v433_v21 }
  0xe4   : > { %740 = vmatpush1.msra.mxu1 %v431_v22 }
 0x11a   : > { %503 = vxpose.xlu1.b32.start.end [1/1] (short) %v427_v23, 128 }
 0x138   : > { %1815 = vset.pattern.permute.xlu1 %v2033_v1 }
 0x159   : > { %v487_v24 = vpop.trf.xlu1 }
 0x15a   : > { %536 = vst.msk [vmem:[#allocation3] sm:$0xff] %vm535_vm1, %v487_v24 }
 0x15d   : > { %v488_v25 = vpop.trf.xlu1 }
 0x15e   : > { %537 = vst.msk [vmem:[#allocation3 + $0x8] sm:$0xff] %vm535_vm1, %v488_v25 }
 0x161   : > { %v489_v26 = vpop.trf.xlu1  ;;  %v570_v27 = vld [vmem:[#allocation3] sm:$0xff] }
 0x162   : > { %538 = vst.msk [vmem:[#allocation3 + $0x10] sm:$0xff] %vm535_vm1, %v489_v26  ;;  %1687 = vmatmul.mubr.msk.f32.vlgmr.msra.gmra.mxu1 %vm535_vm1, %v570_v27 }
 0x163   : > { %779 = vmatprep.mubr.f32.mxu1 %v2800_v0 }
 0x165   : > { %v490_v28 = vpop.trf.xlu1  ;;  %v571_v29 = vld [vmem:[#allocation3 + $0x8] sm:$0xff] }
 0x166   : > { %539 = vst.msk [vmem:[#allocation3 + $0x18] sm:$0xff] %vm535_vm1, %v490_v28  ;;  %1688 = vmatmul.mubr.msk.f32.gmra.mxu1 %vm535_vm1, %v571_v29 }
 0x167   : > { %785 = vmatprep.mubr.f32.mxu1 %v2800_v0 }
 0x169   : > { %v491_v30 = vpop.trf.xlu1  ;;  %v572_v31 = vld [vmem:[#allocation3 + $0x10] sm:$0xff] }
 0x16a   : > { %540 = vst.msk [vmem:[#allocation3 + $0x20] sm:$0xff] %vm535_vm1, %v491_v30  ;;  %1689 = vmatmul.mubr.msk.f32.gmra.mxu1 %vm535_vm1, %v572_v31 }
 0x16b   : > { %791 = vmatprep.mubr.f32.mxu1 %v2800_v0 }
 0x16d   : > { %v492_v32 = vpop.trf.xlu1  ;;  %v573_v33 = vld [vmem:[#allocation3 + $0x18] sm:$0xff] }
 0x16e   : > { %541 = vst.msk [vmem:[#allocation3 + $0x28] sm:$0xff] %vm535_vm1, %v492_v32  ;;  %1690 = vmatmul.mubr.msk.f32.gmra.mxu1 %vm535_vm1, %v573_v33 }
 0x16f   : > { %797 = vmatprep.mubr.f32.mxu1 %v2800_v0 }
 0x171   : > { %v493_v34 = vpop.trf.xlu1  ;;  %v574_v35 = vld [vmem:[#allocation3 + $0x20] sm:$0xff] }
 0x172   : > { %542 = vst.msk [vmem:[#allocation3 + $0x30] sm:$0xff] %vm535_vm1, %v493_v34  ;;  %1691 = vmatmul.mubr.msk.f32.gmra.mxu1 %vm535_vm1, %v574_v35 }
 0x173   : > { %803 = vmatprep.mubr.f32.mxu1 %v2800_v0 }
 0x175   : > { %v494_v36 = vpop.trf.xlu1  ;;  %v575_v37 = vld [vmem:[#allocation3 + $0x28] sm:$0xff] }
 0x176   : > { %543 = vst.msk [vmem:[#allocation3 + $0x38] sm:$0xff] %vm535_vm1, %v494_v36  ;;  %1692 = vmatmul.mubr.msk.f32.gmra.mxu1 %vm535_vm1, %v575_v37 }
 0x177   : > { %809 = vmatprep.mubr.f32.mxu1 %v2800_v0 }
 0x179   : > { %v495_v38 = vpop.trf.xlu1  ;;  %v576_v39 = vld [vmem:[#allocation3 + $0x30] sm:$0xff] }
 0x17a   : > { %544 = vst.msk [vmem:[#allocation3 + $0x40] sm:$0xff] %vm535_vm1, %v495_v38  ;;  %1693 = vmatmul.mubr.msk.f32.gmra.mxu1 %vm535_vm1, %v576_v39 }
 0x17b   : > { %815 = vmatprep.mubr.f32.mxu1 %v2800_v0 }
 0x17d   : > { %v496_v40 = vpop.trf.xlu1  ;;  %v577_v41 = vld [vmem:[#allocation3 + $0x38] sm:$0xff] }
 0x17e   : > { %545 = vst.msk [vmem:[#allocation3 + $0x48] sm:$0xff] %vm535_vm1, %v496_v40  ;;  %1694 = vmatmul.mubr.msk.f32.gmra.mxu1 %vm535_vm1, %v577_v41 }
 0x17f   : > { %821 = vmatprep.mubr.f32.mxu1 %v2800_v0 }
 0x181   : > { %v497_v42 = vpop.trf.xlu1  ;;  %v578_v43 = vld [vmem:[#allocation3 + $0x40] sm:$0xff] }
 0x182   : > { %546 = vst.msk [vmem:[#allocation3 + $0x50] sm:$0xff] %vm535_vm1, %v497_v42  ;;  %1695 = vmatmul.mubr.msk.f32.gmra.mxu1 %vm535_vm1, %v578_v43 }
 0x183   : > { %827 = vmatprep.mubr.f32.mxu1 %v2800_v0 }
 0x185   : > { %v498_v44 = vpop.trf.xlu1  ;;  %v579_v45 = vld [vmem:[#allocation3 + $0x48] sm:$0xff] }
 0x186   : > { %547 = vst.msk [vmem:[#allocation3 + $0x58] sm:$0xff] %vm535_vm1, %v498_v44  ;;  %1696 = vmatmul.mubr.msk.f32.gmra.mxu1 %vm535_vm1, %v579_v45 }
 0x187   : > { %833 = vmatprep.mubr.f32.mxu1 %v2800_v0 }
 0x189   : > { %v499_v46 = vpop.trf.xlu1  ;;  %v580_v47 = vld [vmem:[#allocation3 + $0x50] sm:$0xff] }
 0x18a   : > { %548 = vst.msk [vmem:[#allocation3 + $0x60] sm:$0xff] %vm535_vm1, %v499_v46  ;;  %1697 = vmatmul.mubr.msk.f32.gmra.mxu1 %vm535_vm1, %v580_v47 }
 0x18b   : > { %839 = vmatprep.mubr.f32.mxu1 %v2800_v0 }
 0x18d   : > { %v500_v48 = vpop.trf.xlu1  ;;  %v581_v49 = vld [vmem:[#allocation3 + $0x58] sm:$0xff] }
 0x18e   : > { %549 = vst.msk [vmem:[#allocation3 + $0x68] sm:$0xff] %vm535_vm1, %v500_v48  ;;  %1698 = vmatmul.mubr.msk.f32.gmra.mxu1 %vm535_vm1, %v581_v49 }
 0x18f   : > { %845 = vmatprep.mubr.f32.mxu1 %v2800_v0 }
 0x191   : > { %v501_v50 = vpop.trf.xlu1  ;;  %v582_v51 = vld [vmem:[#allocation3 + $0x60] sm:$0xff] }
 0x192   : > { %550 = vst.msk [vmem:[#allocation3 + $0x70] sm:$0xff] %vm535_vm1, %v501_v50  ;;  %1699 = vmatmul.mubr.msk.f32.gmra.mxu1 %vm535_vm1, %v582_v51 }
 0x193   : > { %851 = vmatprep.mubr.f32.mxu1 %v2800_v0 }
 0x195   : > { %v502_v52 = vpop.trf.xlu1  ;;  %v583_v53 = vld [vmem:[#allocation3 + $0x68] sm:$0xff] }
 0x196   : > { %551 = vst.msk [vmem:[#allocation3 + $0x78] sm:$0xff] %vm535_vm1, %v502_v52  ;;  %1700 = vmatmul.mubr.msk.f32.gmra.mxu1 %vm535_vm1, %v583_v53 }
 0x197   : > { %857 = vmatprep.mubr.f32.mxu1 %v2800_v0 }
 0x199   : > { %v519_v54 = vpop.trf.xlu1  ;;  %v584_v55 = vld [vmem:[#allocation3 + $0x70] sm:$0xff] }
 0x19a   : > { %552 = vst.msk [vmem:[#allocation3 + $0x80] sm:$0xff] %vm535_vm1, %v519_v54  ;;  %1701 = vmatmul.mubr.msk.f32.gmra.mxu1 %vm535_vm1, %v584_v55 }
 0x19b   : > { %863 = vmatprep.mubr.f32.mxu1 %v2800_v0 }
 0x19d   : > { %v520_v56 = vpop.trf.xlu1  ;;  %v585_v57 = vld [vmem:[#allocation3 + $0x78] sm:$0xff] }
 0x19e   : > { %553 = vst.msk [vmem:[#allocation3 + $0x88] sm:$0xff] %vm535_vm1, %v520_v56  ;;  %1702 = vmatmul.mubr.msk.f32.gmra.mxu1 %vm535_vm1, %v585_v57 }
 0x19f   : > { %869 = vmatprep.mubr.f32.mxu1 %v2800_v0 }
 0x1a1   : > { %v521_v58 = vpop.trf.xlu1  ;;  %v586_v59 = vld [vmem:[#allocation3 + $0x80] sm:$0xff] }
 0x1a2   : > { %554 = vst.msk [vmem:[#allocation3 + $0x90] sm:$0xff] %vm535_vm1, %v521_v58  ;;  %1703 = vmatmul.mubr.msk.f32.gmra.mxu1 %vm535_vm1, %v586_v59 }
 0x1a3   : > { %875 = vmatprep.mubr.f32.mxu1 %v2800_v0 }
 0x1a5   : > { %v522_v60 = vpop.trf.xlu1  ;;  %v587_v61 = vld [vmem:[#allocation3 + $0x88] sm:$0xff] }
 0x1a6   : > { %555 = vst.msk [vmem:[#allocation3 + $0x98] sm:$0xff] %vm535_vm1, %v522_v60  ;;  %1704 = vmatmul.mubr.msk.f32.gmra.mxu1 %vm535_vm1, %v587_v61 }
 0x1a7   : > { %881 = vmatprep.mubr.f32.mxu1 %v2800_v0 }
 0x1a9   : > { %v523_v62 = vpop.trf.xlu1  ;;  %v588_v63 = vld [vmem:[#allocation3 + $0x90] sm:$0xff] }
 0x1aa   : > { %556 = vst.msk [vmem:[#allocation3 + $0xa0] sm:$0xff] %vm535_vm1, %v523_v62  ;;  %1705 = vmatmul.mubr.msk.f32.gmra.mxu1 %vm535_vm1, %v588_v63 }
 0x1ab   : > { %887 = vmatprep.mubr.f32.mxu1 %v2800_v0 }
 0x1ad   : > { %v524_v1 = vpop.trf.xlu1  ;;  %v589_v2 = vld [vmem:[#allocation3 + $0x98] sm:$0xff] }
 0x1ae   : > { %557 = vst.msk [vmem:[#allocation3 + $0xa8] sm:$0xff] %vm535_vm1, %v524_v1  ;;  %1706 = vmatmul.mubr.msk.f32.gmra.mxu1 %vm535_vm1, %v589_v2 }
 0x1af   : > { %893 = vmatprep.mubr.f32.mxu1 %v2800_v0 }
 0x1b1   : > { %v525_v3 = vpop.trf.xlu1  ;;  %v590_v4 = vld [vmem:[#allocation3 + $0xa0] sm:$0xff] }
 0x1b2   : > { %558 = vst.msk [vmem:[#allocation3 + $0xb0] sm:$0xff] %vm535_vm1, %v525_v3  ;;  %1707 = vmatmul.mubr.msk.f32.gmra.mxu1 %vm535_vm1, %v590_v4 }
 0x1b3   : > { %899 = vmatprep.mubr.f32.mxu1 %v2800_v0 }
 0x1b5   : > { %v526_v5 = vpop.trf.xlu1  ;;  %v591_v6 = vld [vmem:[#allocation3 + $0xa8] sm:$0xff] }
 0x1b6   : > { %559 = vst.msk [vmem:[#allocation3 + $0xb8] sm:$0xff] %vm535_vm1, %v526_v5  ;;  %1708 = vmatmul.mubr.msk.f32.gmra.mxu1 %vm535_vm1, %v591_v6 }
 0x1b7   : > { %905 = vmatprep.mubr.f32.mxu1 %v2800_v0 }
 0x1b9   : > { %v527_v7 = vpop.trf.xlu1  ;;  %v592_v8 = vld [vmem:[#allocation3 + $0xb0] sm:$0xff] }
 0x1ba   : > { %560 = vst.msk [vmem:[#allocation3 + $0xc0] sm:$0xff] %vm535_vm1, %v527_v7  ;;  %1709 = vmatmul.mubr.msk.f32.gmra.mxu1 %vm535_vm1, %v592_v8 }
 0x1bb   : > { %911 = vmatprep.mubr.f32.mxu1 %v2800_v0 }
 0x1bd   : > { %v528_v9 = vpop.trf.xlu1  ;;  %v593_v10 = vld [vmem:[#allocation3 + $0xb8] sm:$0xff] }
 0x1be   : > { %561 = vst.msk [vmem:[#allocation3 + $0xc8] sm:$0xff] %vm535_vm1, %v528_v9  ;;  %1710 = vmatmul.mubr.msk.f32.gmra.mxu1 %vm535_vm1, %v593_v10 }
 0x1bf   : > { %917 = vmatprep.mubr.f32.mxu1 %v2800_v0 }
 0x1c1   : > { %v529_v11 = vpop.trf.xlu1  ;;  %v594_v12 = vld [vmem:[#allocation3 + $0xc0] sm:$0xff] }
 0x1c2   : > { %562 = vst.msk [vmem:[#allocation3 + $0xd0] sm:$0xff] %vm535_vm1, %v529_v11  ;;  %1711 = vmatmul.mubr.msk.f32.gmra.mxu1 %vm535_vm1, %v594_v12 }
 0x1c3   : > { %923 = vmatprep.mubr.f32.mxu1 %v2800_v0 }
 0x1c5   : > { %v530_v13 = vpop.trf.xlu1  ;;  %v595_v14 = vld [vmem:[#allocation3 + $0xc8] sm:$0xff] }
 0x1c6   : > { %563 = vst.msk [vmem:[#allocation3 + $0xd8] sm:$0xff] %vm535_vm1, %v530_v13  ;;  %1712 = vmatmul.mubr.msk.f32.gmra.mxu1 %vm535_vm1, %v595_v14 }
 0x1c7   : > { %929 = vmatprep.mubr.f32.mxu1 %v2800_v0 }
 0x1c9   : > { %v531_v15 = vpop.trf.xlu1  ;;  %v596_v16 = vld [vmem:[#allocation3 + $0xd0] sm:$0xff] }
 0x1ca   : > { %564 = vst.msk [vmem:[#allocation3 + $0xe0] sm:$0xff] %vm535_vm1, %v531_v15  ;;  %1713 = vmatmul.mubr.msk.f32.gmra.mxu1 %vm535_vm1, %v596_v16 }
 0x1cb   : > { %935 = vmatprep.mubr.f32.mxu1 %v2800_v0 }
 0x1cd   : > { %v532_v17 = vpop.trf.xlu1  ;;  %v597_v18 = vld [vmem:[#allocation3 + $0xd8] sm:$0xff] }
 0x1ce   : > { %565 = vst.msk [vmem:[#allocation3 + $0xe8] sm:$0xff] %vm535_vm1, %v532_v17  ;;  %1714 = vmatmul.mubr.msk.f32.gmra.mxu1 %vm535_vm1, %v597_v18 }
 0x1cf   : > { %941 = vmatprep.mubr.f32.mxu1 %v2800_v0 }
 0x1d1   : > { %v533_v19 = vpop.trf.xlu1  ;;  %v598_v20 = vld [vmem:[#allocation3 + $0xe0] sm:$0xff] }
 0x1d2   : > { %566 = vst.msk [vmem:[#allocation3 + $0xf0] sm:$0xff] %vm535_vm1, %v533_v19  ;;  %1715 = vmatmul.mubr.msk.f32.gmra.mxu1 %vm535_vm1, %v598_v20 }
 0x1d3   : > { %947 = vmatprep.mubr.f32.mxu1 %v2800_v0 }
 0x1d5   : > { %v534_v21 = vpop.trf.xlu1  ;;  %v599_v22 = vld [vmem:[#allocation3 + $0xe8] sm:$0xff] }
 0x1d6   : > { %567 = vst.msk [vmem:[#allocation3 + $0xf8] sm:$0xff] %vm535_vm1, %v534_v21  ;;  %1716 = vmatmul.mubr.msk.f32.gmra.mxu1 %vm535_vm1, %v599_v22 }
 0x1d7   : > { %953 = vmatprep.mubr.f32.mxu1 %v2800_v0 }
 0x1d9   : > { %v600_v23 = vld [vmem:[#allocation3 + $0xf0] sm:$0xff] }
 0x1da   : > { %1717 = vmatmul.mubr.msk.f32.gmra.mxu1 %vm535_vm1, %v600_v23 }
 0x1db   : > { %959 = vmatprep.mubr.f32.mxu1 %v2800_v0 }
 0x1dd   : > { %v601_v24 = vld [vmem:[#allocation3 + $0xf8] sm:$0xff] }
 0x1de   : > { %1718 = vmatmul.mubr.msk.f32.gmra.mxu1 %vm535_vm1, %v601_v24 }
 0x222   : > { %v2204_v25 = vpop.f32.mrf.mxu1 }
 0x224   : > { %v2206_v26 = vpop.f32.mrf.mxu1 }
 0x226   : > { %v2208_v27 = vpop.f32.mrf.mxu1 }
 0x228   : > { %v2210_v28 = vpop.f32.mrf.mxu1 }
 0x22a   : > { %v2212_v29 = vpop.f32.mrf.mxu1 }
 0x22c   : > { %v2214_v30 = vpop.f32.mrf.mxu1 }
 0x22e   : > { %v2216_v31 = vpop.f32.mrf.mxu1 }
 0x230   : > { %v2218_v32 = vpop.f32.mrf.mxu1 }
 0x231   : > { %v975_v24 = vmax.f32 %v2216_v31, %v2218_v32 }
 0x232   : > { %v2220_v33 = vpop.f32.mrf.mxu1 }
 0x234   : > { %v2222_v34 = vpop.f32.mrf.mxu1 }
 0x235   : > { %v978_v20 = vmax.f32 %v2220_v33, %v2222_v34 }
 0x236   : > { %v2224_v35 = vpop.f32.mrf.mxu1 }
 0x238   : > { %v2226_v36 = vpop.f32.mrf.mxu1 }
 0x239   : > { %v981_v16 = vmax.f32 %v2224_v35, %v2226_v36 }
 0x23a   : > { %v2228_v37 = vpop.f32.mrf.mxu1 }
 0x23c   : > { %v2230_v38 = vpop.f32.mrf.mxu1 }
 0x23d   : > { %v984_v11 = vmax.f32 %v2228_v37, %v2230_v38 }
 0x23e   : > { %v2232_v39 = vpop.f32.mrf.mxu1 }
 0x240   : > { %v2234_v40 = vpop.f32.mrf.mxu1 }
 0x241   : > { %v987_v41 = vmax.f32 %v2232_v39, %v2234_v40 }
 0x242   : > { %v2238_v42 = vpop.f32.mrf.mxu1 }
 0x243   : > { %988 = vmax.xlane.f32.xlu1 %v987_v41 }
 0x244   : > { %v2240_v43 = vpop.f32.mrf.mxu1 }
 0x245   : > { %v990_v8 = vmax.f32 %v2238_v42, %v2240_v43 }
 0x246   : > { %v2242_v44 = vpop.f32.mrf.mxu1 }
 0x248   : > { %v2244_v45 = vpop.f32.mrf.mxu1 }
 0x249   : > { %v993_v5 = vmax.f32 %v2242_v44, %v2244_v45 }
 0x24a   : > { %v2246_v46 = vpop.f32.mrf.mxu1 }
 0x24c   : > { %v2248_v47 = vpop.f32.mrf.mxu1 }
 0x24d   : > { %v996_v2 = vmax.f32 %v2246_v46, %v2248_v47 }
 0x24e   : > { %v2250_v48 = vpop.f32.mrf.mxu1 }
 0x250   : > { %v2252_v49 = vpop.f32.mrf.mxu1 }
 0x251   : > { %v999_v50 = vmax.f32 %v2250_v48, %v2252_v49 }
 0x252   : > { %v2256_v51 = vpop.f32.mrf.mxu1 }
 0x253   : > { %1000 = vmax.xlane.f32.xlu0 %v999_v50 }
 0x254   : > { %v2258_v52 = vpop.f32.mrf.mxu1 }
 0x255   : > { %v1002_v53 = vmax.f32 %v2256_v51, %v2258_v52 }
 0x256   : > { %v2262_v54 = vpop.f32.mrf.mxu1 }
 0x257   : > { %1003 = vmax.xlane.f32.xlu0 %v1002_v53  ;;  %v972_v53 = vmax.f32 %v2212_v29, %v2214_v30 }
 0x258   : > { %v2264_v55 = vpop.f32.mrf.mxu1 }
 0x259   : > { %v1005_v56 = vmax.f32 %v2262_v54, %v2264_v55 }
 0x25a   : > { %v2268_v57 = vpop.f32.mrf.mxu1 }
 0x25b   : > { %1006 = vmax.xlane.f32.xlu0 %v1005_v56 }
 0x25c   : > { %v2270_v58 = vpop.f32.mrf.mxu1 }
 0x25d   : > { %v1008_v59 = vmax.f32 %v2268_v57, %v2270_v58 }
 0x25e   : > { %v2274_v60 = vpop.f32.mrf.mxu1 }
 0x25f   : > { %1009 = vmax.xlane.f32.xlu0 %v1008_v59 }
 0x260   : > { %v2276_v61 = vpop.f32.mrf.mxu1 }
 0x261   : > { %v1011_v62 = vmax.f32 %v2274_v60, %v2276_v61 }
 0x262   : > { %v2280_v63 = vpop.f32.mrf.mxu1 }
 0x263   : > { %2831 = vst [vmem:[#allocation5_spill] sm:$0xff] %v2280_v63  ;;  %1012 = vmax.xlane.f32.xlu0 %v1011_v62  ;;  %v969_v62 = vmax.f32 %v2208_v27, %v2210_v28 }
 0x264   : > { %v2282_v1 = vpop.f32.mrf.mxu1 }
 0x265   : > { %2832 = vst [vmem:[#allocation6_spill] sm:$0xff] %v2282_v1  ;;  %v1014_v22 = vmax.f32 %v2280_v63, %v2282_v1 }
 0x266   : > { %v2286_v3 = vpop.f32.mrf.mxu1 }
 0x267   : > { %2833 = vst [vmem:[#allocation7_spill] sm:$0xff] %v2286_v3  ;;  %997 = vmax.xlane.f32.xlu0 %v996_v2 }
 0x268   : > { %v2288_v4 = vpop.f32.mrf.mxu1 }
 0x269   : > { %2834 = vst [vmem:[#allocation8_spill] sm:$0xff] %v2288_v4  ;;  %v1017_v18 = vmax.f32 %v2286_v3, %v2288_v4 }
 0x26a   : > { %v2292_v6 = vpop.f32.mrf.mxu1 }
 0x26b   : > { %2835 = vst [vmem:[#allocation9_spill] sm:$0xff] %v2292_v6  ;;  %994 = vmax.xlane.f32.xlu0 %v993_v5 }
 0x26c   : > { %v2294_v7 = vpop.f32.mrf.mxu1 }
 0x26d   : > { %2836 = vst [vmem:[#allocation10_spill] sm:$0xff] %v2294_v7  ;;  %v1020_v14 = vmax.f32 %v2292_v6, %v2294_v7  ;;  %v2847_v6 = vmov 0.0  }
 0x26e   : > { %v2298_v9 = vpop.f32.mrf.mxu1 }
 0x26f   : > { %2837 = vst [vmem:[#allocation11_spill] sm:$0xff] %v2298_v9  ;;  %991 = vmax.xlane.f32.xlu0 %v990_v8  ;;  %v966_v8 = vmax.f32 %v2204_v25, %v2206_v26 }
 0x270   : > { %v2300_v10 = vpop.f32.mrf.mxu1 }
 0x271   : > { %2838 = vst [vmem:[#allocation12_spill] sm:$0xff] %v2300_v10  ;;  %v1023_v12 = vmax.f32 %v2298_v9, %v2300_v10 }
 0x272   : > { %v2306_v13 = vpop.f32.mrf.mxu1 }
 0x273   : > { %985 = vmax.xlane.f32.xlu0 %v984_v11  ;;  %1024 = vmax.xlane.f32.xlu1 %v1023_v12 }
 0x274   : > { %v2310_v15 = vpop.f32.mrf.mxu1 }
 0x276   : > { %v2314_v17 = vpop.f32.mrf.mxu1 }
 0x277   : > { %982 = vmax.xlane.f32.xlu0 %v981_v16  ;;  %1021 = vmax.xlane.f32.xlu1 %v1020_v14 }
 0x278   : > { %v2318_v19 = vpop.f32.mrf.mxu1 }
 0x27a   : > { %v2322_v21 = vpop.f32.mrf.mxu1 }
 0x27b   : > { %2839 = vst [vmem:[#allocation13_spill] sm:$0xff] %v2322_v21  ;;  %979 = vmax.xlane.f32.xlu0 %v978_v20  ;;  %1018 = vmax.xlane.f32.xlu1 %v1017_v18 }
 0x27c   : > { %v2326_v23 = vpop.f32.mrf.mxu1 }
 0x27d   : > { %2840 = vst [vmem:[#allocation14_spill] sm:$0xff] %v2326_v23 }
 0x27e   : > { %v2330_v41 = vpop.f32.mrf.mxu1 }
 0x27f   : > { %2841 = vst [vmem:[#allocation15_spill] sm:$0xff] %v2330_v41  ;;  %976 = vmax.xlane.f32.xlu0 %v975_v24  ;;  %1015 = vmax.xlane.f32.xlu1 %v1014_v22 }
 0x280   : > { %v2332_v50 = vpop.f32.mrf.mxu1 }
 0x281   : > { %2842 = vst [vmem:[#allocation16_spill] sm:$0xff] %v2332_v50  ;;  %v1035_v3 = vmax.f32 %v2330_v41, %v2332_v50 }
 0x282   : > { %v2336_v56 = vpop.f32.mrf.mxu1 }
 0x283   : > { %2843 = vst [vmem:[#allocation17_spill] sm:$0xff] %v2336_v56  ;;  %973 = vmax.xlane.f32.xlu0 %v972_v53 }
 0x284   : > { %v2338_v59 = vpop.f32.mrf.mxu1 }
 0x285   : > { %2844 = vst [vmem:[#allocation18_spill] sm:$0xff] %v2338_v59 }
 0x286   : > { %v2342_v2 = vpop.f32.mrf.mxu1 }
 0x287   : > { %2845 = vst [vmem:[#allocation19_spill] sm:$0xff] %v2342_v2  ;;  %970 = vmax.xlane.f32.xlu0 %v969_v62 }
 0x288   : > { %v2344_v5 = vpop.f32.mrf.mxu1 }
 0x289   : > { %2846 = vst [vmem:[#allocation20_spill] sm:$0xff] %v2344_v5  ;;  %v1041_v4 = vmax.f32 %v2342_v2, %v2344_v5 }
 0x28a   : > { %v2348_v11 = vpop.f32.mrf.mxu1 }
 0x28b   : > { %967 = vmax.xlane.f32.xlu0 %v966_v8 }
 0x28c   : > { %v2350_v12 = vpop.f32.mrf.mxu1 }
 0x28d   : > { %v1044_v14 = vmax.f32 %v2348_v11, %v2350_v12 }
 0x28e   : > { %v2354_v16 = vpop.f32.mrf.mxu1 }
 0x28f   : > { %1045 = vmax.xlane.f32.xlu0 %v1044_v14 }
 0x290   : > { %v2356_v18 = vpop.f32.mrf.mxu1 }
 0x291   : > { %v1047_v20 = vmax.f32 %v2354_v16, %v2356_v18 }
 0x292   : > { %v2360_v22 = vpop.f32.mrf.mxu1 }
 0x293   : > { %1048 = vmax.xlane.f32.xlu0 %v1047_v20 }
 0x294   : > { %v2362_v24 = vpop.f32.mrf.mxu1 }
 0x295   : > { %v1050_v53 = vmax.f32 %v2360_v22, %v2362_v24 }
 0x296   : > { %v2366_v62 = vpop.f32.mrf.mxu1 }
 0x297   : > { %1051 = vmax.xlane.f32.xlu0 %v1050_v53 }
 0x298   : > { %v2368_v8 = vpop.f32.mrf.mxu1 }
 0x299   : > { %v1053_v14 = vmax.f32 %v2366_v62, %v2368_v8 }
 0x29a   : > { %v2372_v0 = vpop.f32.mrf.mxu1 }
 0x29b   : > { %1054 = vmax.xlane.f32.xlu0 %v1053_v14  ;;  %v1038_v14 = vmax.f32 %v2336_v56, %v2338_v59 }
 0x29c   : > { %v2374_v1 = vpop.f32.mrf.mxu1 }
 0x29d   : > { %v1056_v20 = vmax.f32 %v2372_v0, %v2374_v1 }
 0x29e   : > { %v2378_v63 = vpop.f32.mrf.mxu1 }
 0x29f   : > { %1057 = vmax.xlane.f32.xlu0 %v1056_v20  ;;  %v1032_v20 = vmax.f32 %v2322_v21, %v2326_v23 }
 0x2a0   : > { %v2380_v7 = vpop.f32.mrf.mxu1 }
 0x2a1   : > { %v1059_v53 = vmax.f32 %v2378_v63, %v2380_v7 }
 0x2a3   : > { %1060 = vmax.xlane.f32.xlu0 %v1059_v53  ;;  %v291_v53 = vld [vmem:[%s2796_s2 + $0x10] sm:$0xff] }
 0x2a4   : > { %1683 = vmatmul.mubr.msk.f32.gmra.mxu0 %vm339_vm0, %v291_v53 }
 0x2a5   : > { %440 = vmatprep.mubr.f32.mxu0 %v2847_v6 }
 0x2a7   : > { %1042 = vmax.xlane.f32.xlu0 %v1041_v4  ;;  %v292_v4 = vld [vmem:[%s2796_s2 + $0x18] sm:$0xff] }
 0x2a8   : > { %1684 = vmatmul.mubr.msk.f32.gmra.mxu0 %vm339_vm0, %v292_v4 }
 0x2a9   : > { %446 = vmatprep.mubr.f32.mxu0 %v2847_v6 }
 0x2ab   : > { %1039 = vmax.xlane.f32.xlu0 %v1038_v14 }
 0x2af   : > { %1036 = vmax.xlane.f32.xlu0 %v1035_v3 }
 0x2b3   : > { %1033 = vmax.xlane.f32.xlu0 %v1032_v20 }
 0x2dc   : > { %v1001_v3 = vpop.xlane.xlu0 %1000 }
 0x2e0   : > { %v1004_v14 = vpop.xlane.xlu0 %1003 }
 0x2e1   : > { %v1086_v4 = vsub.f32 %v2256_v51, %v1004_v14  ;;  %v1087_v5 = vsub.f32 %v2258_v52, %v1004_v14  ;;  %v1084_v51 = vsub.f32 %v2250_v48, %v1001_v3 }
 0x2e4   : > { %v1007_v10 = vpop.xlane.xlu0 %1006 }
 0x2e5   : > { %v1088_v20 = vsub.f32 %v2262_v54, %v1007_v10  ;;  %v1089_v9 = vsub.f32 %v2264_v55, %v1007_v10 }
 0x2e7   : > { %v1178_v23 = vmul.f32 1.442695, %v1088_v20  ;;  %v1180_v21 = vmul.f32 1.442695, %v1089_v9  ;;  %v1174_v9 = vmul.f32 1.442695, %v1086_v4 }
 0x2e8   : > { %v1010_v53 = vpop.xlane.xlu0 %1009 }
 0x2e9   : > { %1816 = vpow2.f32 %v1178_v23  ;;  %v1090_v50 = vsub.f32 %v2268_v57, %v1010_v53  ;;  %v1091_v41 = vsub.f32 %v2270_v58, %v1010_v53  ;;  %v1176_v57 = vmul.f32 1.442695, %v1087_v5 }
 0x2ea   : > { %1818 = vpow2.f32 %v1180_v21  ;;  %v1085_v58 = vsub.f32 %v2252_v49, %v1001_v3 }
 0x2eb   : > { %v1182_v59 = vmul.f32 1.442695, %v1090_v50  ;;  %v1184_v56 = vmul.f32 1.442695, %v1091_v41 }
 0x2ec   : > { %v1013_v2 = vpop.xlane.xlu0 %1012  ;;  %v1172_v41 = vmul.f32 1.442695, %v1085_v58 }
 0x2ed   : > { %1820 = vpow2.f32 %v1182_v59  ;;  %v1092_v54 = vsub.f32 %v2274_v60, %v1013_v2  ;;  %v1093_v55 = vsub.f32 %v2276_v61, %v1013_v2  ;;  %v1170_v61 = vmul.f32 1.442695, %v1084_v51 }
 0x2ee   : > { %1822 = vpow2.f32 %v1184_v56 }
 0x2ef   : > { %v1186_v10 = vmul.f32 1.442695, %v1092_v54  ;;  %v1188_v23 = vmul.f32 1.442695, %v1093_v55 }
 0x2f0   : > { %v998_v20 = vpop.xlane.xlu0 %997 }
 0x2f1   : > { %1824 = vpow2.f32 %v1186_v10  ;;  %v1082_v2 = vsub.f32 %v2246_v46, %v998_v20  ;;  %v1083_v49 = vsub.f32 %v2248_v47, %v998_v20 }
 0x2f2   : > { %1826 = vpow2.f32 %v1188_v23 }
 0x2f3   : > { %1828 = vpow2.f32 %v1174_v9  ;;  %v1166_v53 = vmul.f32 1.442695, %v1082_v2  ;;  %v1168_v55 = vmul.f32 1.442695, %v1083_v49 }
 0x2f4   : > { %1830 = vpow2.f32 %v1176_v57  ;;  %v995_v52 = vpop.xlane.xlu0 %994 }
 0x2f5   : > { %1832 = vpow2.f32 %v1170_v61  ;;  %v1080_v54 = vsub.f32 %v2242_v44, %v995_v52  ;;  %v1081_v9 = vsub.f32 %v2244_v45, %v995_v52 }
 0x2f6   : > { %v2412_v21 = vpop.eup %1816  ;;  %1834 = vpow2.f32 %v1172_v41  ;;  %v989_v41 = vpop.xlane.xlu1 %988 }
 0x2f7   : > { %v2414_v60 = vpop.eup %1818  ;;  %1836 = vpow2.f32 %v1166_v53  ;;  %v1162_v51 = vmul.f32 1.442695, %v1080_v54  ;;  %v1164_v45 = vmul.f32 1.442695, %v1081_v9  ;;  %v1029_v53 = vmax.f32 %v2314_v17, %v2318_v19 }
 0x2f8   : > { %v992_v50 = vpop.xlane.xlu0 %991  ;;  %v1293_v56 = vadd.f32 %v2414_v60, %v2412_v21  ;;  %1838 = vpow2.f32 %v1168_v55 }
 0x2f9   : > { %v1078_v44 = vsub.f32 %v2238_v42, %v992_v50  ;;  %v1079_v52 = vsub.f32 %v2240_v43, %v992_v50  ;;  %v1077_v50 = vsub.f32 %v2234_v40, %v989_v41 }
 0x2fa   : > { %v2418_v59 = vpop.eup %1820  ;;  %1294 = vadd.xlane.f32.xlu0 %v1293_v56 }
 0x2fb   : > { %v2421_v48 = vpop.eup %1822  ;;  %v1158_v42 = vmul.f32 1.442695, %v1078_v44  ;;  %v1160_v49 = vmul.f32 1.442695, %v1079_v52 }
 0x2fc   : > { %v986_v5 = vpop.xlane.xlu0 %985  ;;  %v1296_v3 = vadd.f32 %v2421_v48, %v2418_v59 }
 0x2fd   : > { %v1074_v55 = vsub.f32 %v2228_v37, %v986_v5  ;;  %v1075_v9 = vsub.f32 %v2230_v38, %v986_v5 }
 0x2fe   : > { %v2426_v14 = vpop.eup %1824  ;;  %1297 = vadd.xlane.f32.xlu0 %v1296_v3 }
 0x2ff   : > { %v2428_v4 = vpop.eup %1826  ;;  %v1150_v44 = vmul.f32 1.442695, %v1074_v55  ;;  %v1152_v37 = vmul.f32 1.442695, %v1075_v9 }
 0x300   : > { %v2431_v46 = vpop.eup %1828  ;;  %v983_v10 = vpop.xlane.xlu0 %982  ;;  %v1299_v47 = vadd.f32 %v2428_v4, %v2426_v14 }
 0x301   : > { %v2436_v23 = vpop.eup %1830  ;;  %v1072_v57 = vsub.f32 %v2224_v35, %v983_v10  ;;  %v1073_v20 = vsub.f32 %v2226_v36, %v983_v10  ;;  %v293_v35 = vld [vmem:[%s2796_s2 + $0x20] sm:$0xff]  ;;  %v1076_v36 = vsub.f32 %v2232_v39, %v989_v41 }
 0x302   : > { %1300 = vadd.xlane.f32.xlu0 %v1299_v47  ;;  %v1290_v2 = vadd.f32 %v2436_v23, %v2431_v46  ;;  %1685 = vmatmul.mubr.msk.f32.gmra.mxu0 %vm339_vm0, %v293_v35  ;;  %v2450_v43 = vpop.eup %1832 }
 0x303   : > { %v1146_v58 = vmul.f32 1.442695, %v1072_v57  ;;  %v1148_v61 = vmul.f32 1.442695, %v1073_v20  ;;  %452 = vmatprep.mubr.f32.mxu0 %v2847_v6  ;;  %v2455_v54 = vpop.eup %1834  ;;  %v1154_v10 = vmul.f32 1.442695, %v1076_v36 }
 0x304   : > { %v980_v56 = vpop.xlane.xlu0 %979  ;;  %v1156_v57 = vmul.f32 1.442695, %v1077_v50 }
 0x305   : > { %1840 = vpow2.f32 %v1146_v58  ;;  %v1071_v38 = vsub.f32 %v2222_v34, %v980_v56  ;;  %v1026_v58 = vmax.f32 %v2306_v13, %v2310_v15 }
 0x306   : > { %1842 = vpow2.f32 %v1148_v61  ;;  %1291 = vadd.xlane.f32.xlu0 %v1290_v2 }
 0x307   : > { %1844 = vpow2.f32 %v1162_v51  ;;  %v1287_v51 = vadd.f32 %v2455_v54, %v2450_v43 }
 0x308   : > { %1846 = vpow2.f32 %v1164_v45  ;;  %v977_v3 = vpop.xlane.xlu0 %976 }
 0x309   : > { %v1068_v6 = vsub.f32 %v2216_v31, %v977_v3  ;;  %v1069_v39 = vsub.f32 %v2218_v32, %v977_v3  ;;  %1848 = vpow2.f32 %v1158_v42  ;;  %v2463_v31 = vpop.eup %1836  ;;  %v1070_v32 = vsub.f32 %v2220_v33, %v980_v56 }
 0x30a   : > { %1030 = vmax.xlane.f32.xlu0 %v1029_v53  ;;  %1850 = vpow2.f32 %v1160_v49  ;;  %v2469_v61 = vpop.eup %1838  ;;  %v1144_v42 = vmul.f32 1.442695, %v1071_v38 }
 0x30b   : > { %v1138_v40 = vmul.f32 1.442695, %v1068_v6  ;;  %v1140_v47 = vmul.f32 1.442695, %v1069_v39  ;;  %v1142_v33 = vmul.f32 1.442695, %v1070_v32 }
 0x30c   : > { %v974_v20 = vpop.xlane.xlu0 %973 }
 0x30d   : > { %1852 = vpow2.f32 %v1138_v40  ;;  %v1066_v34 = vsub.f32 %v2212_v29, %v974_v20  ;;  %v1067_v50 = vsub.f32 %v2214_v30, %v974_v20  ;;  %v294_v40 = vld [vmem:[%s2796_s2 + $0x28] sm:$0xff] }
 0x30e   : > { %1854 = vpow2.f32 %v1140_v47  ;;  %1288 = vadd.xlane.f32.xlu0 %v1287_v51  ;;  %1686 = vmatmul.mubr.msk.f32.gmra.mxu0 %vm339_vm0, %v294_v40 }
 0x30f   : > { %1856 = vpow2.f32 %v1154_v10  ;;  %v1134_v29 = vmul.f32 1.442695, %v1066_v34  ;;  %v1136_v30 = vmul.f32 1.442695, %v1067_v50 }
 0x310   : > { %1858 = vpow2.f32 %v1156_v57  ;;  %v971_v5 = vpop.xlane.xlu0 %970 }
 0x311   : > { %1860 = vpow2.f32 %v1150_v44  ;;  %v1064_v41 = vsub.f32 %v2208_v27, %v971_v5  ;;  %v1065_v45 = vsub.f32 %v2210_v28, %v971_v5  ;;  %v1284_v28 = vadd.f32 %v2469_v61, %v2463_v31 }
 0x312   : > { %v2473_v52 = vpop.eup %1840  ;;  %1862 = vpow2.f32 %v1152_v37  ;;  %1027 = vmax.xlane.f32.xlu0 %v1026_v58 }
 0x313   : > { %v2475_v2 = vpop.eup %1842  ;;  %v1130_v56 = vmul.f32 1.442695, %v1064_v41  ;;  %v1132_v35 = vmul.f32 1.442695, %v1065_v45 }
 0x314   : > { %v2478_v36 = vpop.eup %1844  ;;  %v968_v49 = vpop.xlane.xlu0 %967  ;;  %v1269_v27 = vadd.f32 %v2475_v2, %v2473_v52 }
 0x315   : > { %v2485_v3 = vpop.eup %1846  ;;  %1864 = vpow2.f32 %v1130_v56  ;;  %v1062_v53 = vsub.f32 %v2204_v25, %v968_v49  ;;  %v1063_v6 = vsub.f32 %v2206_v26, %v968_v49 }
 0x316   : > { %1866 = vpow2.f32 %v1132_v35  ;;  %1270 = vadd.xlane.f32.xlu1 %v1269_v27  ;;  %1285 = vadd.xlane.f32.xlu0 %v1284_v28  ;;  %v2488_v55 = vpop.eup %1848  ;;  %v1281_v9 = vadd.f32 %v2485_v3, %v2478_v36 }
 0x317   : > { %1868 = vpow2.f32 %v1142_v33  ;;  %v2493_v10 = vpop.eup %1850  ;;  %v1126_v57 = vmul.f32 1.442695, %v1062_v53  ;;  %v1128_v20 = vmul.f32 1.442695, %v1063_v6 }
 0x318   : > { %1870 = vpow2.f32 %v1144_v42  ;;  %v1046_v39 = vpop.xlane.xlu0 %1045  ;;  %v1278_v37 = vadd.f32 %v2493_v10, %v2488_v55 }
 0x319   : > { %1872 = vpow2.f32 %v1134_v29  ;;  %v1114_v33 = vsub.f32 %v2348_v11, %v1046_v39  ;;  %v1115_v35 = vsub.f32 %v2350_v12, %v1046_v39 }
 0x31a   : > { %v2498_v47 = vpop.eup %1852  ;;  %1282 = vadd.xlane.f32.xlu0 %v1281_v9  ;;  %1874 = vpow2.f32 %v1136_v30 }
 0x31b   : > { %v2501_v25 = vpop.eup %1854  ;;  %1876 = vpow2.f32 %v1126_v57  ;;  %v1230_v28 = vmul.f32 1.442695, %v1114_v33  ;;  %v1232_v53 = vmul.f32 1.442695, %v1115_v35 }
 0x31c   : > { %v2503_v26 = vpop.eup %1856  ;;  %v2505_v51 = vpop.xlane.xlu0 %1048  ;;  %v1263_v44 = vadd.f32 %v2501_v25, %v2498_v47  ;;  %1878 = vpow2.f32 %v1128_v20 }
 0x31d   : > { %v2511_v32 = vpop.eup %1858  ;;  %1880 = vpow2.f32 %v1230_v28 }
 0x31e   : > { %v2513_v38 = vpop.eup %1860  ;;  %1264 = vadd.xlane.f32.xlu1 %v1263_v44  ;;  %1279 = vadd.xlane.f32.xlu0 %v1278_v37  ;;  %v1275_v41 = vadd.f32 %v2511_v32, %v2503_v26  ;;  %1882 = vpow2.f32 %v1232_v53 }
 0x31f   : > { %v2515_v5 = vpop.eup %1862 }
 0x320   : > { %v1052_v58 = vpop.xlane.xlu0 %1051  ;;  %v1272_v49 = vadd.f32 %v2515_v5, %v2513_v38 }
 0x321   : > { %v1118_v11 = vsub.f32 %v2360_v22, %v1052_v58  ;;  %v1119_v30 = vsub.f32 %v2362_v24, %v1052_v58 }
 0x322   : > { %v2519_v45 = vpop.eup %1864  ;;  %1276 = vadd.xlane.f32.xlu0 %v1275_v41 }
 0x323   : > { %v2522_v34 = vpop.eup %1866  ;;  %v1238_v57 = vmul.f32 1.442695, %v1118_v11  ;;  %v1240_v24 = vmul.f32 1.442695, %v1119_v30 }
 0x324   : > { %v2524_v56 = vpop.eup %1868  ;;  %v1055_v42 = vpop.xlane.xlu0 %1054  ;;  %v1257_v50 = vadd.f32 %v2522_v34, %v2519_v45 }
 0x325   : > { %v2531_v27 = vpop.eup %1870  ;;  %v1120_v22 = vsub.f32 %v2366_v62, %v1055_v42  ;;  %v1121_v58 = vsub.f32 %v2368_v8, %v1055_v42  ;;  %v1116_v62 = vsub.f32 %v2354_v16, %v2505_v51  ;;  %v1117_v42 = vsub.f32 %v2356_v18, %v2505_v51  ;;  %v2848_v16 = vld [vmem:[#allocation19_spill] sm:$0xff]  ;;  %v2851_v51 = vld [vmem:[#allocation18_spill] sm:$0xff] }
 0x326   : > { %1258 = vadd.xlane.f32.xlu1 %v1257_v50  ;;  %1273 = vadd.xlane.f32.xlu0 %v1272_v49  ;;  %v2534_v29 = vpop.eup %1872  ;;  %v1266_v6 = vadd.f32 %v2531_v27, %v2524_v56 }
 0x327   : > { %v2539_v39 = vpop.eup %1874  ;;  %v1242_v50 = vmul.f32 1.442695, %v1120_v22  ;;  %v1244_v28 = vmul.f32 1.442695, %v1121_v58  ;;  %v1236_v30 = vmul.f32 1.442695, %v1117_v42 }
 0x328   : > { %v1058_v12 = vpop.xlane.xlu0 %1057  ;;  %v2544_v37 = vpop.eup %1876  ;;  %v1260_v33 = vadd.f32 %v2539_v39, %v2534_v29 }
 0x329   : > { %v1122_v9 = vsub.f32 %v2372_v0, %v1058_v12  ;;  %v1123_v40 = vsub.f32 %v2374_v1, %v1058_v12  ;;  %v2549_v0 = vpop.eup %1878  ;;  %v2849_v12 = vld [vmem:[#allocation20_spill] sm:$0xff] }
 0x32a   : > { %1267 = vadd.xlane.f32.xlu0 %v1266_v6  ;;  %v2563_v22 = vpop.eup %1880 }
 0x32b   : > { %v1246_v20 = vmul.f32 1.442695, %v1122_v9  ;;  %v1248_v44 = vmul.f32 1.442695, %v1123_v40  ;;  %v2850_v40 = vld [vmem:[#allocation17_spill] sm:$0xff]  ;;  %2852 = vst [vmem:[#allocation19_spill] sm:$0xff] %v2563_v22 }
 0x32c   : > { %v1061_v41 = vpop.xlane.xlu0 %1060 }
 0x32d   : > { %1884 = vpow2.f32 %v1246_v20  ;;  %v1124_v1 = vsub.f32 %v2378_v63, %v1061_v41  ;;  %v1125_v35 = vsub.f32 %v2380_v7, %v1061_v41  ;;  %v1254_v63 = vadd.f32 %v2549_v0, %v2544_v37 }
 0x32e   : > { %1886 = vpow2.f32 %v1248_v44  ;;  %1261 = vadd.xlane.f32.xlu0 %v1260_v33  ;;  %v1234_v7 = vmul.f32 1.442695, %v1116_v62  ;;  %v2565_v33 = vpop.eup %1882  ;;  %v2855_v62 = vld [vmem:[#allocation16_spill] sm:$0xff] }
 0x32f   : > { %1888 = vpow2.f32 %v1238_v57  ;;  %v1250_v49 = vmul.f32 1.442695, %v1124_v1  ;;  %v1252_v8 = vmul.f32 1.442695, %v1125_v35  ;;  %2853 = vst [vmem:[#allocation20_spill] sm:$0xff] %v2565_v33  ;;  %v2854_v1 = vld [vmem:[#allocation15_spill] sm:$0xff] }
 0x330   : > { %1890 = vpow2.f32 %v1240_v24  ;;  %v1043_v11 = vpop.xlane.xlu0 %1042 }
 0x331   : > { %1892 = vpow2.f32 %v1250_v49  ;;  %v1112_v53 = vsub.f32 %v2848_v16, %v1043_v11  ;;  %v1113_v6 = vsub.f32 %v2849_v12, %v1043_v11  ;;  %v2858_v12 = vld [vmem:[#allocation14_spill] sm:$0xff] }
 0x332   : > { %1894 = vpow2.f32 %v1252_v8  ;;  %1255 = vadd.xlane.f32.xlu0 %v1254_v63 }
 0x333   : > { %1896 = vpow2.f32 %v1242_v50  ;;  %v1226_v20 = vmul.f32 1.442695, %v1112_v53  ;;  %v1228_v58 = vmul.f32 1.442695, %v1113_v6  ;;  %v2857_v53 = vld [vmem:[#allocation13_spill] sm:$0xff] }
 0x334   : > { %1898 = vpow2.f32 %v1244_v28  ;;  %v1040_v9 = vpop.xlane.xlu0 %1039 }
 0x335   : > { %v1110_v18 = vsub.f32 %v2850_v40, %v1040_v9  ;;  %v1111_v57 = vsub.f32 %v2851_v51, %v1040_v9  ;;  %1900 = vpow2.f32 %v1234_v7 }
 0x336   : > { %1902 = vpow2.f32 %v1236_v30 }
 0x337   : > { %v1222_v44 = vmul.f32 1.442695, %v1110_v18  ;;  %v1224_v24 = vmul.f32 1.442695, %v1111_v57 }
 0x338   : > { %v1037_v41 = vpop.xlane.xlu0 %1036 }
 0x339   : > { %1904 = vpow2.f32 %v1222_v44  ;;  %v1108_v35 = vsub.f32 %v2854_v1, %v1037_v41  ;;  %v1109_v50 = vsub.f32 %v2855_v62, %v1037_v41  ;;  %v1332_v1 = vadd.f32 %v2565_v33, %v2563_v22 }
 0x33a   : > { %v2569_v49 = vpop.eup %1884  ;;  %1906 = vpow2.f32 %v1224_v24 }
 0x33b   : > { %v2571_v8 = vpop.eup %1886  ;;  %1908 = vpow2.f32 %v1226_v20  ;;  %v1218_v42 = vmul.f32 1.442695, %v1108_v35  ;;  %v1220_v11 = vmul.f32 1.442695, %v1109_v50 }
 0x33c   : > { %v2573_v28 = vpop.eup %1888  ;;  %1910 = vpow2.f32 %v1228_v58  ;;  %v1034_v63 = vpop.xlane.xlu0 %1033  ;;  %v1344_v7 = vadd.f32 %v2571_v8, %v2569_v49 }
 0x33d   : > { %2856 = vst [vmem:[#allocation17_spill] sm:$0xff] %v2573_v28  ;;  %v2577_v16 = vpop.eup %1890  ;;  %v1106_v30 = vsub.f32 %v2857_v53, %v1034_v63  ;;  %v1107_v6 = vsub.f32 %v2858_v12, %v1034_v63  ;;  %1912 = vpow2.f32 %v1218_v42 }
 0x33e   : > { %v2581_v9 = vpop.eup %1892  ;;  %1345 = vadd.xlane.f32.xlu0 %v1344_v7  ;;  %1914 = vpow2.f32 %v1220_v11  ;;  %v1338_v44 = vadd.f32 %v2577_v16, %v2573_v28 }
 0x33f   : > { %v2583_v40 = vpop.eup %1894  ;;  %v1214_v18 = vmul.f32 1.442695, %v1106_v30  ;;  %v1216_v51 = vmul.f32 1.442695, %v1107_v6 }
 0x340   : > { %v2585_v57 = vpop.eup %1896  ;;  %v1347_v20 = vadd.f32 %v2583_v40, %v2581_v9 }
 0x341   : > { %v2591_v24 = vpop.eup %1898  ;;  %1916 = vpow2.f32 %v1214_v18 }
 0x342   : > { %1918 = vpow2.f32 %v1216_v51  ;;  %1348 = vadd.xlane.f32.xlu1 %v1347_v20  ;;  %1339 = vadd.xlane.f32.xlu0 %v1338_v44  ;;  %v2593_v58 = vpop.eup %1900  ;;  %v1341_v41 = vadd.f32 %v2591_v24, %v2585_v57 }
 0x343   : > { %2859 = vst [vmem:[#allocation18_spill] sm:$0xff] %v2593_v58  ;;  %v2599_v35 = vpop.eup %1902 }
 0x344   : > { %2860 = vst [vmem:[#allocation15_spill] sm:$0xff] %v2599_v35  ;;  %v1335_v11 = vadd.f32 %v2599_v35, %v2593_v58  ;;  %v2873_v35 = vld [vmem:[#allocation8_spill] sm:$0xff] }
 0x346   : > { %v2601_v62 = vpop.eup %1904  ;;  %1342 = vadd.xlane.f32.xlu1 %v1341_v41  ;;  %1333 = vadd.xlane.f32.xlu0 %v1332_v1  ;;  %v1025_v41 = vpop.xlane.xlu1 %1024 }
 0x347   : > { %2861 = vst [vmem:[#allocation16_spill] sm:$0xff] %v2601_v62  ;;  %v2603_v50 = vpop.eup %1906 }
 0x348   : > { %2862 = vst [vmem:[#allocation13_spill] sm:$0xff] %v2603_v50  ;;  %v2605_v42 = vpop.eup %1908  ;;  %v1326_v63 = vadd.f32 %v2603_v50, %v2601_v62  ;;  %v2869_v62 = vld [vmem:[#allocation11_spill] sm:$0xff] }
 0x349   : > { %2863 = vst [vmem:[#allocation14_spill] sm:$0xff] %v2605_v42  ;;  %v2611_v7 = vpop.eup %1910  ;;  %v1100_v50 = vsub.f32 %v2869_v62, %v1025_v41 }
 0x34a   : > { %2864 = vst [vmem:[#allocation21_spill] sm:$0xff] %v2611_v7  ;;  %1336 = vadd.xlane.f32.xlu1 %v1335_v11  ;;  %1327 = vadd.xlane.f32.xlu0 %v1326_v63  ;;  %v2613_v53 = vpop.eup %1912  ;;  %v1329_v30 = vadd.f32 %v2611_v7, %v2605_v42  ;;  %v1022_v63 = vpop.xlane.xlu1 %1021  ;;  %v2870_v42 = vld [vmem:[#allocation12_spill] sm:$0xff] }
 0x34b   : > { %2865 = vst [vmem:[#allocation22_spill] sm:$0xff] %v2613_v53  ;;  %v2617_v12 = vpop.eup %1914  ;;  %v1101_v7 = vsub.f32 %v2870_v42, %v1025_v41  ;;  %v1202_v22 = vmul.f32 1.442695, %v1100_v50 }
 0x34c   : > { %2866 = vst [vmem:[#allocation23_spill] sm:$0xff] %v2617_v12  ;;  %v1323_v51 = vadd.f32 %v2617_v12, %v2613_v53 }
 0x34d   : > { %v1204_v62 = vmul.f32 1.442695, %v1101_v7 }
 0x34e   : > { %v2619_v6 = vpop.eup %1916  ;;  %1330 = vadd.xlane.f32.xlu1 %v1329_v30  ;;  %v1019_v53 = vpop.xlane.xlu1 %1018 }
 0x34f   : > { %2867 = vst [vmem:[#allocation24_spill] sm:$0xff] %v2619_v6  ;;  %v2621_v18 = vpop.eup %1918 }
 0x350   : > { %2868 = vst [vmem:[#allocation25_spill] sm:$0xff] %v2621_v18  ;;  %v1320_v20 = vadd.f32 %v2621_v18, %v2619_v6  ;;  %v2871_v6 = vld [vmem:[#allocation9_spill] sm:$0xff] }
 0x351   : > { %v1098_v18 = vsub.f32 %v2871_v6, %v1022_v63 }
 0x352   : > { %1324 = vadd.xlane.f32.xlu1 %v1323_v51  ;;  %1321 = vadd.xlane.f32.xlu0 %v1320_v20 }
 0x353   : > { %v1198_v41 = vmul.f32 1.442695, %v1098_v18 }
 0x383   : > { %v1295_v44 = vpop.xlane.xlu0 %1294 }
 0x387   : > { %v1298_v1 = vpop.xlane.xlu0 %1297 }
 0x388   : > { %1920 = vrcp.f32 %v1298_v1  ;;  %v2872_v1 = vld [vmem:[#allocation7_spill] sm:$0xff] }
 0x389   : > { %v1096_v33 = vsub.f32 %v2872_v1, %v1019_v53 }
 0x38b   : > { %v1301_v11 = vpop.xlane.xlu0 %1300 }
 0x38c   : > { %1922 = vrcp.f32 %v1301_v11 }
 0x38d   : > { %1924 = vrcp.f32 %v1295_v44  ;;  %v1097_v44 = vsub.f32 %v2873_v35, %v1019_v53 }
 0x38f   : > { %v1292_v30 = vpop.xlane.xlu0 %1291 }
 0x390   : > { %1926 = vrcp.f32 %v1292_v30  ;;  %v1194_v30 = vmul.f32 1.442695, %v1096_v33 }
 0x391   : > { %1928 = vpow2.f32 %v1202_v22  ;;  %v1016_v22 = vpop.xlane.xlu1 %1015 }
 0x393   : > { %v1031_v12 = vpop.xlane.xlu0 %1030 }
 0x394   : > { %v1104_v51 = vsub.f32 %v2314_v17, %v1031_v12  ;;  %v1105_v20 = vsub.f32 %v2318_v19, %v1031_v12  ;;  %v2874_v12 = vld [vmem:[#allocation10_spill] sm:$0xff] }
 0x395   : > { %v1921_v42 = vpop.eup %1920  ;;  %v1099_v6 = vsub.f32 %v2874_v12, %v1022_v63 }
 0x396   : > { %v1210_v11 = vmul.f32 1.442695, %v1104_v51  ;;  %v1212_v58 = vmul.f32 1.442695, %v1105_v20  ;;  %v1196_v51 = vmul.f32 1.442695, %v1097_v44  ;;  %v1393_v1 = vmul.f32 %v1921_v42, %v2418_v59 }
 0x397   : > { %v1289_v28 = vpop.xlane.xlu0 %1288  ;;  %v1200_v63 = vmul.f32 1.442695, %v1099_v6 }
 0x398   : > { %1930 = vpow2.f32 %v1210_v11 }
 0x399   : > { %v1923_v50 = vpop.eup %1922  ;;  %1932 = vpow2.f32 %v1212_v58  ;;  %v1394_v58 = vmul.f32 %v1921_v42, %v2421_v48 }
 0x39a   : > { %1934 = vrcp.f32 %v1289_v28  ;;  %v1397_v17 = vmul.f32 %v1923_v50, %v2428_v4  ;;  %v1396_v19 = vmul.f32 %v1923_v50, %v2426_v14  ;;  %v1925_v33 = vpop.eup %1924  ;;  %v2875_v14 = vld [vmem:[#allocation5_spill] sm:$0xff] }
 0x39b   : > { %1936 = vpow2.f32 %v1204_v62  ;;  %v1028_v7 = vpop.xlane.xlu0 %1027  ;;  %v1094_v4 = vsub.f32 %v2875_v14, %v1016_v22  ;;  %v1391_v48 = vmul.f32 %v1925_v33, %v2414_v60 }
 0x39c   : > { %v1102_v35 = vsub.f32 %v2306_v13, %v1028_v7  ;;  %v1103_v53 = vsub.f32 %v2310_v15, %v1028_v7  ;;  %1446 = vmatprep.subr.mxu0 %v1397_v17  ;;  %1724 = vmatprep.subr.mxu1 %v1397_v17  ;;  %1938 = vpow2.f32 %v1198_v41  ;;  %v2876_v13 = vld [vmem:[#allocation6_spill] sm:$0xff]  ;;  %v1390_v41 = vmul.f32 %v1925_v33, %v2412_v21 }
 0x39d   : > { %1447 = vmatpush1.xpose.msra.mxu0 %v1396_v19  ;;  %1756 = vmatpush1.xpose.msra.mxu1 %v1396_v19  ;;  %1940 = vpow2.f32 %v1194_v30  ;;  %v1095_v20 = vsub.f32 %v2876_v13, %v1016_v22  ;;  %v1927_v11 = vpop.eup %1926  ;;  %v1190_v62 = vmul.f32 1.442695, %v1094_v4 }
 0x39e   : > { %v1206_v28 = vmul.f32 1.442695, %v1102_v35  ;;  %v1208_v18 = vmul.f32 1.442695, %v1103_v53  ;;  %1448 = vmatprep.subr.mxu0 %v1394_v58  ;;  %1725 = vmatprep.subr.mxu1 %v1394_v58  ;;  %1942 = vpow2.f32 %v1196_v51  ;;  %v2645_v30 = vpop.eup %1928  ;;  %v1388_v59 = vmul.f32 %v1927_v11, %v2436_v23 }
 0x39f   : > { %v1286_v15 = vpop.xlane.xlu0 %1285  ;;  %v1192_v44 = vmul.f32 1.442695, %v1095_v20  ;;  %v1387_v12 = vmul.f32 %v1927_v11, %v2431_v46  ;;  %v1271_v14 = vpop.xlane.xlu1 %1270 }
 0x3a0   : > { %1944 = vpow2.f32 %v1206_v28 }
 0x3a1   : > { %1946 = vpow2.f32 %v1208_v18  ;;  %1449 = vmatpush1.xpose.msra.mxu0 %v1393_v1  ;;  %1757 = vmatpush1.xpose.msra.mxu1 %v1393_v1 }
 0x3a2   : > { %1948 = vrcp.f32 %v1286_v15  ;;  %1450 = vmatprep.subr.mxu0 %v1391_v48  ;;  %1726 = vmatprep.subr.mxu1 %v1391_v48 }
 0x3a3   : > { %1950 = vpow2.f32 %v1200_v63  ;;  %v1283_v50 = vpop.xlane.xlu0 %1282 }
 0x3a4   : > { %1952 = vrcp.f32 %v1283_v50 }
 0x3a5   : > { %v2648_v42 = vpop.eup %1930  ;;  %1451 = vmatpush1.xpose.msra.mxu0 %v1390_v41  ;;  %1758 = vmatpush1.xpose.msra.mxu1 %v1390_v41  ;;  %1954 = vpow2.f32 %v1190_v62 }
 0x3a6   : > { %v2650_v60 = vpop.eup %1932  ;;  %1452 = vmatprep.subr.mxu0 %v1388_v59  ;;  %1727 = vmatprep.subr.mxu1 %v1388_v59  ;;  %1956 = vpow2.f32 %v1192_v44 }
 0x3a7   : > { %v1935_v17 = vpop.eup %1934  ;;  %v1280_v19 = vpop.xlane.xlu0 %1279  ;;  %v1317_v21 = vadd.f32 %v2650_v60, %v2648_v42 }
 0x3a8   : > { %v2655_v6 = vpop.eup %1936  ;;  %1958 = vrcp.f32 %v1280_v19  ;;  %v1385_v23 = vmul.f32 %v1935_v17, %v2455_v54  ;;  %v1384_v46 = vmul.f32 %v1935_v17, %v2450_v43 }
 0x3a9   : > { %1318 = vadd.xlane.f32.xlu1 %v1317_v21  ;;  %1453 = vmatpush1.xpose.msra.mxu0 %v1387_v12  ;;  %v2658_v51 = vpop.eup %1938  ;;  %v1311_v35 = vadd.f32 %v2655_v6, %v2645_v30 }
 0x3aa   : > { %1759 = vmatpush1.xpose.msra.mxu1 %v1387_v12  ;;  %1454 = vmatprep.subr.mxu0 %v1385_v23  ;;  %v2660_v22 = vpop.eup %1940 }
 0x3ab   : > { %1728 = vmatprep.subr.mxu1 %v1385_v23  ;;  %v1277_v7 = vpop.xlane.xlu0 %1276  ;;  %v2665_v53 = vpop.eup %1942 }
 0x3ac   : > { %1960 = vrcp.f32 %v1277_v7  ;;  %v1305_v18 = vadd.f32 %v2665_v53, %v2660_v22 }
 0x3ad   : > { %v2667_v58 = vpop.eup %1944  ;;  %1312 = vadd.xlane.f32.xlu1 %v1311_v35  ;;  %1455 = vmatpush1.xpose.msra.mxu0 %v1384_v46 }
 0x3ae   : > { %v2669_v54 = vpop.eup %1946  ;;  %1760 = vmatpush1.xpose.msra.mxu1 %v1384_v46 }
 0x3af   : > { %v1949_v33 = vpop.eup %1948  ;;  %v1274_v4 = vpop.xlane.xlu0 %1273  ;;  %v1314_v28 = vadd.f32 %v2669_v54, %v2667_v58 }
 0x3b0   : > { %v2675_v43 = vpop.eup %1950  ;;  %1962 = vrcp.f32 %v1274_v4  ;;  %v1382_v63 = vmul.f32 %v1949_v33, %v2469_v61  ;;  %v1381_v13 = vmul.f32 %v1949_v33, %v2463_v31 }
 0x3b1   : > { %v1953_v20 = vpop.eup %1952  ;;  %1315 = vadd.xlane.f32.xlu0 %v1314_v28  ;;  %1306 = vadd.xlane.f32.xlu1 %v1305_v18  ;;  %1964 = vrcp.f32 %v1271_v14  ;;  %v1308_v11 = vadd.f32 %v2675_v43, %v2658_v51 }
 0x3b2   : > { %1456 = vmatprep.subr.mxu0 %v1382_v63  ;;  %1729 = vmatprep.subr.mxu1 %v1382_v63  ;;  %v1379_v15 = vmul.f32 %v1953_v20, %v2485_v3  ;;  %v2680_v1 = vpop.eup %1954  ;;  %v1378_v61 = vmul.f32 %v1953_v20, %v2478_v36  ;;  %v1265_v3 = vpop.xlane.xlu1 %1264  ;;  %v307_v63 = vld [vmem:[%s2797_s3 + $0x20] sm:$0xff] }
 0x3b3   : > { %1457 = vmatpush1.xpose.msra.mxu0 %v1381_v13  ;;  %1761 = vmatpush1.xpose.msra.mxu1 %v1381_v13  ;;  %v1268_v48 = vpop.xlane.xlu0 %1267  ;;  %v2685_v62 = vpop.eup %1956 }
 0x3b4   : > { %1458 = vmatprep.subr.mxu0 %v1379_v15  ;;  %1730 = vmatprep.subr.mxu1 %v1379_v15  ;;  %1966 = vrcp.f32 %v1268_v48  ;;  %v1302_v50 = vadd.f32 %v2685_v62, %v2680_v1 }
 0x3b5   : > { %v1959_v31 = vpop.eup %1958  ;;  %1309 = vadd.xlane.f32.xlu0 %v1308_v11  ;;  %1968 = vrcp.f32 %v1265_v3 }
 0x3b6   : > { %v1376_v44 = vmul.f32 %v1959_v31, %v2493_v10  ;;  %v1375_v41 = vmul.f32 %v1959_v31, %v2488_v55  ;;  %v1259_v55 = vpop.xlane.xlu1 %1258 }
 0x3b7   : > { %1459 = vmatpush1.xpose.msra.mxu0 %v1378_v61  ;;  %1762 = vmatpush1.xpose.msra.mxu1 %v1378_v61  ;;  %v1262_v17 = vpop.xlane.xlu0 %1261 }
 0x3b8   : > { %1460 = vmatprep.subr.mxu0 %v1376_v44  ;;  %1731 = vmatprep.subr.mxu1 %v1376_v44  ;;  %1970 = vrcp.f32 %v1262_v17 }
 0x3b9   : > { %v1961_v36 = vpop.eup %1960  ;;  %1303 = vadd.xlane.f32.xlu0 %v1302_v50  ;;  %1972 = vrcp.f32 %v1259_v55 }
 0x3ba   : > { %v1373_v59 = vmul.f32 %v1961_v36, %v2511_v32  ;;  %v1372_v10 = vmul.f32 %v1961_v36, %v2503_v26  ;;  %v306_v32 = vld [vmem:[%s2797_s3 + $0x18] sm:$0xff] }
 0x3bb   : > { %1461 = vmatpush1.xpose.msra.mxu0 %v1375_v41  ;;  %1763 = vmatpush1.xpose.msra.mxu1 %v1375_v41  ;;  %v1256_v35 = vpop.xlane.xlu0 %1255 }
 0x3bc   : > { %1462 = vmatprep.subr.mxu0 %v1373_v59  ;;  %1732 = vmatprep.subr.mxu1 %v1373_v59  ;;  %1974 = vrcp.f32 %v1256_v35 }
 0x3bd   : > { %v1963_v19 = vpop.eup %1962 }
 0x3be   : > { %v1370_v21 = vmul.f32 %v1963_v19, %v2515_v5  ;;  %v1965_v12 = vpop.eup %1964  ;;  %v1369_v23 = vmul.f32 %v1963_v19, %v2513_v38  ;;  %v305_v5 = vld [vmem:[%s2797_s3 + $0x10] sm:$0xff] }
 0x3bf   : > { %1463 = vmatpush1.xpose.msra.mxu0 %v1372_v10  ;;  %1764 = vmatpush1.xpose.msra.mxu1 %v1372_v10  ;;  %v1367_v26 = vmul.f32 %v1965_v12, %v2475_v2  ;;  %v1366_v38 = vmul.f32 %v1965_v12, %v2473_v52  ;;  %v308_v2 = vld [vmem:[%s2797_s3 + $0x28] sm:$0xff] }
 0x3c0   : > { %1464 = vmatprep.subr.mxu0 %v1370_v21  ;;  %1733 = vmatprep.subr.mxu1 %v1370_v21 }
 0x3c1   : > { %v1967_v7 = vpop.eup %1966 }
 0x3c2   : > { %326 = vperm.xlu1 %1815, %v306_v32   ;;  %v1364_v46 = vmul.f32 %v1967_v7, %v2531_v27  ;;  %v1969_v33 = vpop.eup %1968  ;;  %v1363_v14 = vmul.f32 %v1967_v7, %v2524_v56  ;;  %v2881_v7 = vld [vmem:[#allocation19_spill] sm:$0xff] }
 0x3c3   : > { %1465 = vmatpush1.xpose.msra.mxu0 %v1369_v23  ;;  %1765 = vmatpush1.xpose.msra.mxu1 %v1369_v23  ;;  %v1361_v4 = vmul.f32 %v1969_v33, %v2501_v25  ;;  %v1360_v18 = vmul.f32 %v1969_v33, %v2498_v47  ;;  %v2883_v33 = vld [vmem:[#allocation14_spill] sm:$0xff] }
 0x3c4   : > { %1466 = vmatprep.subr.mxu0 %v1367_v26  ;;  %1734 = vmatprep.subr.mxu1 %v1367_v26 }
 0x3c5   : > { %v1971_v28 = vpop.eup %1970 }
 0x3c6   : > { %321 = vperm.xlu1 %1815, %v305_v5   ;;  %v1358_v56 = vmul.f32 %v1971_v28, %v2539_v39  ;;  %v1973_v13 = vpop.eup %1972  ;;  %v1357_v20 = vmul.f32 %v1971_v28, %v2534_v29  ;;  %v2882_v5 = vld [vmem:[#allocation21_spill] sm:$0xff] }
 0x3c7   : > { %1467 = vmatpush1.xpose.msra.mxu0 %v1366_v38  ;;  %1766 = vmatpush1.xpose.msra.mxu1 %v1366_v38  ;;  %v1346_v52 = vpop.xlane.xlu0 %1345  ;;  %v1355_v15 = vmul.f32 %v1973_v13, %v2522_v34  ;;  %v1354_v39 = vmul.f32 %v1973_v13, %v2519_v45  ;;  %v2887_v13 = vld [vmem:[#allocation22_spill] sm:$0xff] }
 0x3c8   : > { %1468 = vmatprep.subr.mxu0 %v1364_v46  ;;  %1735 = vmatprep.subr.mxu1 %v1364_v46 }
 0x3c9   : > { %v1975_v47 = vpop.eup %1974 }
 0x3ca   : > { %336 = vperm.xlu1 %1815, %v308_v2   ;;  %v1352_v11 = vmul.f32 %v1975_v47, %v2549_v0  ;;  %v1351_v29 = vmul.f32 %v1975_v47, %v2544_v37  ;;  %v2889_v47 = vld [vmem:[#allocation24_spill] sm:$0xff] }
 0x3cb   : > { %1469 = vmatpush1.xpose.msra.mxu0 %v1363_v14  ;;  %1767 = vmatpush1.xpose.msra.mxu1 %v1363_v14  ;;  %v1349_v27 = vpop.xlane.xlu1 %1348  ;;  %v1340_v48 = vpop.xlane.xlu0 %1339  ;;  %v2884_v14 = vld [vmem:[#allocation13_spill] sm:$0xff] }
 0x3cc   : > { %1470 = vmatprep.subr.mxu0 %v1361_v4  ;;  %1736 = vmatprep.subr.mxu1 %v1361_v4  ;;  %1976 = vrcp.f32 %v1349_v27 }
 0x3cd   : > { %1978 = vrcp.f32 %v1346_v52  ;;  %v2885_v52 = vld [vmem:[#allocation16_spill] sm:$0xff] }
 0x3cf   : > { %1471 = vmatpush1.xpose.msra.mxu0 %v1360_v18  ;;  %1768 = vmatpush1.xpose.msra.mxu1 %v1360_v18  ;;  %v1343_v25 = vpop.xlane.xlu1 %1342  ;;  %v1334_v44 = vpop.xlane.xlu0 %1333  ;;  %v2886_v18 = vld [vmem:[#allocation23_spill] sm:$0xff] }
 0x3d0   : > { %331 = vperm.xlu0 %1814, %v307_v63   ;;  %1472 = vmatprep.subr.mxu0 %v1358_v56  ;;  %1980 = vrcp.f32 %v1343_v25 }
 0x3d1   : > { %1737 = vmatprep.subr.mxu1 %v1358_v56  ;;  %1982 = vrcp.f32 %v1340_v48 }
 0x3d3   : > { %1473 = vmatpush1.xpose.msra.mxu0 %v1357_v20  ;;  %1769 = vmatpush1.xpose.msra.mxu1 %v1357_v20  ;;  %v1337_v61 = vpop.xlane.xlu1 %1336  ;;  %v2888_v20 = vld [vmem:[#allocation25_spill] sm:$0xff] }
 0x3d4   : > { %1474 = vmatprep.subr.mxu0 %v1355_v15  ;;  %1738 = vmatprep.subr.mxu1 %v1355_v15  ;;  %1984 = vrcp.f32 %v1337_v61 }
 0x3d5   : > { %1986 = vrcp.f32 %v1334_v44 }
 0x3d7   : > { %1475 = vmatpush1.xpose.msra.mxu0 %v1354_v39  ;;  %1770 = vmatpush1.xpose.msra.mxu1 %v1354_v39  ;;  %v1331_v41 = vpop.xlane.xlu1 %1330  ;;  %v2739_v39 = vpop.f32.mrf.mxu0 }
 0x3d8   : > { %1476 = vmatprep.subr.mxu0 %v1352_v11  ;;  %1739 = vmatprep.subr.mxu1 %v1352_v11  ;;  %1988 = vrcp.f32 %v1331_v41 }
 0x3d9   : > { %v1977_v31 = vpop.eup %1976  ;;  %v438_v61 = vpop.f32.mrf.mxu0 }
 0x3da   : > { %v1979_v34 = vpop.eup %1978  ;;  %v1445_v3 = vmul.f32 %v1977_v31, %v2583_v40  ;;  %v1444_v45 = vmul.f32 %v1977_v31, %v2581_v9  ;;  %v1328_v40 = vpop.xlane.xlu0 %1327 }
 0x3db   : > { %1477 = vmatpush1.xpose.msra.mxu0 %v1351_v29  ;;  %1771 = vmatpush1.xpose.msra.mxu1 %v1351_v29  ;;  %v1442_v0 = vmul.f32 %v1979_v34, %v2571_v8  ;;  %v1441_v37 = vmul.f32 %v1979_v34, %v2569_v49  ;;  %1990 = vrcp.f32 %v1328_v40  ;;  %v1325_v10 = vpop.xlane.xlu1 %1324  ;;  %v2877_v49 = vld [vmem:[#allocation17_spill] sm:$0xff]  ;;  %v2741_v31 = vpop.f32.mrf.mxu0 }
 0x3dc   : > { %1478 = vmatprep.subr.mxu0 %v1445_v3  ;;  %1740 = vmatprep.subr.mxu1 %v1445_v3  ;;  %1992 = vrcp.f32 %v1325_v10 }
 0x3dd   : > { %v1981_v50 = vpop.eup %1980  ;;  %v444_v3 = vpop.f32.mrf.mxu0 }
 0x3de   : > { %v1439_v36 = vmul.f32 %v1981_v50, %v2591_v24  ;;  %v1983_v59 = vpop.eup %1982  ;;  %v1438_v9 = vmul.f32 %v1981_v50, %v2585_v57  ;;  %v2878_v24 = vld [vmem:[#allocation15_spill] sm:$0xff]  ;;  %v1322_v55 = vpop.xlane.xlu0 %1321  ;;  %v2879_v57 = vld [vmem:[#allocation18_spill] sm:$0xff] }
 0x3df   : > { %1479 = vmatpush2.xpose.msra.mxu0 %v1444_v45  ;;  %1772 = vmatpush2.xpose.msra.mxu1 %v1444_v45  ;;  %v1436_v8 = vmul.f32 %v1983_v59, %v2577_v16  ;;  %v1435_v19 = vmul.f32 %v1983_v59, %v2877_v49  ;;  %1994 = vrcp.f32 %v1322_v55  ;;  %v2880_v16 = vld [vmem:[#allocation20_spill] sm:$0xff] }
 0x3e0   : > { %1480 = vmatprep.subr.mxu0 %v1442_v0  ;;  %1741 = vmatprep.subr.mxu1 %v1442_v0 }
 0x3e1   : > { %v1985_v17 = vpop.eup %1984 }
 0x3e2   : > { %v1433_v21 = vmul.f32 %v1985_v17, %v2878_v24  ;;  %v1987_v12 = vpop.eup %1986  ;;  %v1432_v23 = vmul.f32 %v1985_v17, %v2879_v57 }
 0x3e3   : > { %1481 = vmatpush2.xpose.msra.mxu0 %v1441_v37  ;;  %1773 = vmatpush2.xpose.msra.mxu1 %v1441_v37  ;;  %v1430_v32 = vmul.f32 %v1987_v12, %v2880_v16  ;;  %v1429_v35 = vmul.f32 %v1987_v12, %v2881_v7 }
 0x3e4   : > { %1482 = vmatprep.subr.mxu0 %v1439_v36  ;;  %1742 = vmatprep.subr.mxu1 %v1439_v36 }
 0x3e5   : > { %v1989_v26 = vpop.eup %1988 }
 0x3e6   : > { %v1427_v38 = vmul.f32 %v1989_v26, %v2882_v5  ;;  %v1426_v2 = vmul.f32 %v1989_v26, %v2883_v33  ;;  %v1547_v33 = vld [vmem:[%s2761_s7 + $0x10] sm:$0xff] }
 0x3e7   : > { %1483 = vmatpush2.xpose.msra.mxu0 %v1438_v9  ;;  %1774 = vmatpush2.xpose.msra.mxu1 %v1438_v9 }
 0x3e8   : > { %1484 = vmatprep.subr.mxu0 %v1436_v8  ;;  %1743 = vmatprep.subr.mxu1 %v1436_v8  ;;  %v1991_v46 = vpop.eup %1990 }
 0x3e9   : > { %v1424_v4 = vmul.f32 %v1991_v46, %v2884_v14  ;;  %v1993_v28 = vpop.eup %1992  ;;  %v1423_v27 = vmul.f32 %v1991_v46, %v2885_v52 }
 0x3ea   : > { %v1421_v63 = vmul.f32 %v1993_v28, %v2886_v18  ;;  %v1420_v25 = vmul.f32 %v1993_v28, %v2887_v13  ;;  %v1546_v28 = vld [vmem:[%s2761_s7 + $0x8] sm:$0xff] }
 0x3eb   : > { %1485 = vmatpush2.xpose.msra.mxu0 %v1435_v19  ;;  %1775 = vmatpush2.xpose.msra.mxu1 %v1435_v19 }
 0x3ec   : > { %1486 = vmatprep.subr.mxu0 %v1433_v21  ;;  %1744 = vmatprep.subr.mxu1 %v1433_v21  ;;  %v1995_v56 = vpop.eup %1994 }
 0x3ed   : > { %v1418_v15 = vmul.f32 %v1995_v56, %v2888_v20  ;;  %v1417_v48 = vmul.f32 %v1995_v56, %v2889_v47  ;;  %v1549_v20 = vld [vmem:[%s2761_s7 + $0x20] sm:$0xff] }
 0x3ef   : > { %1487 = vmatpush2.xpose.msra.mxu0 %v1432_v23  ;;  %1776 = vmatpush2.xpose.msra.mxu1 %v1432_v23 }
 0x3f0   : > { %1488 = vmatprep.subr.mxu0 %v1430_v32  ;;  %1745 = vmatprep.subr.mxu1 %v1430_v32 }
 0x3f3   : > { %1489 = vmatpush2.xpose.msra.mxu0 %v1429_v35  ;;  %1777 = vmatpush2.xpose.msra.mxu1 %v1429_v35  ;;  %v1536_v35 = vstv %s1535_s29 }
 0x3f4   : > { %1490 = vmatprep.subr.mxu0 %v1427_v38  ;;  %1746 = vmatprep.subr.mxu1 %v1427_v38  ;;  %v1545_v38 = vld [vmem:[%s2761_s7] sm:$0xff] }
 0x3f7   : > { %1491 = vmatpush2.xpose.msra.mxu0 %v1426_v2  ;;  %1778 = vmatpush2.xpose.msra.mxu1 %v1426_v2 }
 0x3f8   : > { %1492 = vmatprep.subr.mxu0 %v1424_v4  ;;  %1747 = vmatprep.subr.mxu1 %v1424_v4 }
 0x3fb   : > { %1493 = vmatpush2.xpose.msra.mxu0 %v1423_v27  ;;  %1779 = vmatpush2.xpose.msra.mxu1 %v1423_v27  ;;  %v1548_v27 = vld [vmem:[%s2761_s7 + $0x18] sm:$0xff] }
 0x3fc   : > { %1494 = vmatprep.subr.mxu0 %v1421_v63  ;;  %1748 = vmatprep.subr.mxu1 %v1421_v63 }
 0x3ff   : > { %1495 = vmatpush2.xpose.msra.mxu0 %v1420_v25  ;;  %1780 = vmatpush2.xpose.msra.mxu1 %v1420_v25 }
 0x400   : > { %1496 = vmatprep.subr.mxu0 %v1418_v15  ;;  %1749 = vmatprep.subr.mxu1 %v1418_v15 }
 0x403   : > { %1497 = vmatpush2.xpose.msra.mxu0 %v1417_v48  ;;  %1781 = vmatpush2.xpose.msra.mxu1 %v1417_v48 }
 0x432   : > { %v1319_v11 = vpop.xlane.xlu1 %1318 }
 0x433   : > { %1996 = vrcp.f32 %v1319_v11  ;;  %v1550_v11 = vld [vmem:[%s2761_s7 + $0x28] sm:$0xff] }
 0x436   : > { %v1313_v29 = vpop.xlane.xlu1 %1312 }
 0x437   : > { %1998 = vrcp.f32 %v1313_v29 }
 0x43a   : > { %v1316_v34 = vpop.xlane.xlu0 %1315  ;;  %v1307_v44 = vpop.xlane.xlu1 %1306 }
 0x43b   : > { %2000 = vrcp.f32 %v1316_v34  ;;  %v1551_v34 = vld [vmem:[%s2761_s7 + $0x30] sm:$0xff] }
 0x43e   : > { %v1310_v45 = vpop.xlane.xlu0 %1309  ;;  %v327_v0 = vpop.permute.xlu1 %326 }
 0x43f   : > { %2002 = vrcp.f32 %v1310_v45  ;;  %v445_v50 = vadd.f32 %v444_v3, %v327_v0 }
 0x440   : > { %v1997_v41 = vpop.eup %1996  ;;  %2004 = vrcp.f32 %v1307_v44 }
 0x441   : > { %v1415_v37 = vmul.f32 %v1997_v41, %v2650_v60  ;;  %v1414_v36 = vmul.f32 %v1997_v41, %v2648_v42  ;;  %1516 = vmatprep.mubr.f32.mxu1 %v445_v50 }
 0x442   : > { %v322_v59 = vpop.permute.xlu1 %321  ;;  %v1304_v9 = vpop.xlane.xlu0 %1303 }
 0x443   : > { %1498 = vmatprep.subr.mxu0 %v1415_v37  ;;  %1750 = vmatprep.subr.mxu1 %v1415_v37  ;;  %v439_v40 = vadd.f32 %v438_v61, %v322_v59  ;;  %2006 = vrcp.f32 %v1304_v9  ;;  %v437_v16 = vadd.f32 %v2739_v39, %v322_v59 }
 0x444   : > { %1499 = vmatpush2.xpose.msra.mxu0 %v1414_v36  ;;  %1782 = vmatpush2.xpose.msra.mxu1 %v1414_v36  ;;  %v1999_v8 = vpop.eup %1998 }
 0x445   : > { %1510 = vmatprep.mubr.f32.mxu0 %v439_v40  ;;  %v1409_v42 = vmul.f32 %v1999_v8, %v2655_v6  ;;  %v1408_v19 = vmul.f32 %v1999_v8, %v2645_v30  ;;  %v448_v6 = vpop.f32.mrf.mxu0 }
 0x446   : > { %v337_v26 = vpop.permute.xlu1 %336 }
 0x448   : > { %v2001_v17 = vpop.eup %2000 }
 0x449   : > { %v1412_v10 = vmul.f32 %v2001_v17, %v2669_v54  ;;  %v1411_v49 = vmul.f32 %v2001_v17, %v2667_v58 }
 0x44b   : > { %1500 = vmatprep.subr.mxu0 %v1412_v10  ;;  %1751 = vmatprep.subr.mxu1 %v1412_v10 }
 0x44c   : > { %v2003_v60 = vpop.eup %2002  ;;  %1501 = vmatpush2.xpose.msra.mxu0 %v1411_v49  ;;  %1783 = vmatpush2.xpose.msra.mxu1 %v1411_v49 }
 0x44d   : > { %1502 = vmatprep.subr.mxu0 %v1409_v42  ;;  %1752 = vmatprep.subr.mxu1 %v1409_v42  ;;  %v1406_v24 = vmul.f32 %v2003_v60, %v2675_v43  ;;  %v2005_v21 = vpop.eup %2004  ;;  %v1405_v58 = vmul.f32 %v2003_v60, %v2658_v51  ;;  %v450_v43 = vpop.f32.mrf.mxu0 }
 0x44e   : > { %v1403_v54 = vmul.f32 %v2005_v21, %v2665_v53  ;;  %v1402_v55 = vmul.f32 %v2005_v21, %v2660_v22  ;;  %v332_v51 = vpop.permute.xlu0 %331  ;;  %v443_v53 = vadd.f32 %v2741_v31, %v327_v0  ;;  %v1552_v0 = vld [vmem:[%s2761_s7 + $0x38] sm:$0xff] }
 0x44f   : > { %v454_v23 = vpop.f32.mrf.mxu0  ;;  %v451_v32 = vadd.f32 %v450_v43, %v332_v51 }
 0x450   : > { %1503 = vmatpush2.xpose.msra.mxu0 %v1408_v19  ;;  %1784 = vmatpush2.xpose.msra.mxu1 %v1408_v19  ;;  %v2007_v12 = vpop.eup %2006 }
 0x451   : > { %1504 = vmatprep.subr.mxu0 %v1406_v24  ;;  %1753 = vmatprep.subr.mxu1 %v1406_v24  ;;  %v1400_v30 = vmul.f32 %v2007_v12, %v2685_v62  ;;  %v1399_v57 = vmul.f32 %v2007_v12, %v2680_v1  ;;  %v456_v22 = vpop.f32.mrf.mxu0  ;;  %v449_v62 = vadd.f32 %v448_v6, %v332_v51 }
 0x452   : > { %v457_v7 = vadd.f32 %v456_v22, %v337_v26  ;;  %v455_v1 = vadd.f32 %v454_v23, %v337_v26 }
 0x454   : > { %1505 = vmatpush2.xpose.msra.mxu0 %v1405_v58  ;;  %1785 = vmatpush2.xpose.msra.mxu1 %v1405_v58 }
 0x455   : > { %1506 = vmatprep.subr.mxu0 %v1403_v54  ;;  %1754 = vmatprep.subr.mxu1 %v1403_v54 }
 0x458   : > { %1507 = vmatpush2.xpose.msra.mxu0 %v1402_v55  ;;  %1786 = vmatpush2.xpose.msra.mxu1 %v1402_v55 }
 0x459   : > { %1508 = vmatprep.subr.mxu0 %v1400_v30  ;;  %1755 = vmatprep.subr.mxu1 %v1400_v30 }
 0x45c   : > { %1509 = vmatpush2.xpose.msra.mxu0 %v1399_v57  ;;  %1787 = vmatpush2.xpose.msra.mxu1 %v1399_v57 }
 0x45f   : > { %1511 = vmatmul.mubr.f32.vlgmr.msra.gmra.mxu0 %v437_v16  ;;  %1517 = vmatmul.mubr.f32.vlgmr.msra.gmra.mxu1 %v443_v53 }
 0x460   : > { %1522 = vmatprep.mubr.f32.mxu1 %v451_v32 }
 0x463   : > { %1523 = vmatmul.mubr.f32.gmra.mxu1 %v449_v62 }
 0x464   : > { %1528 = vmatprep.mubr.f32.mxu1 %v457_v7 }
 0x467   : > { %1529 = vmatmul.mubr.f32.gmra.mxu1 %v455_v1 }
 0x51f   : > { %v1512_v5 = vpop.f32.mrf.mxu0  ;;  %v1518_v46 = vpop.f32.mrf.mxu1 }
 0x520   : > { %v1537_v2 = vmul.f32 %v1536_v35, %v1512_v5  ;;  %v1539_v14 = vmul.f32 %v1536_v35, %v1518_v46 }
 0x521   : > { %v1514_v4 = vpop.f32.mrf.mxu0  ;;  %v1520_v52 = vpop.f32.mrf.mxu1 }
 0x522   : > { %v1553_v18 = vadd.f32 %v1545_v38, %v1537_v2  ;;  %v1555_v63 = vadd.f32 %v1547_v33, %v1539_v14  ;;  %v1538_v56 = vmul.f32 %v1536_v35, %v1514_v4  ;;  %v1540_v13 = vmul.f32 %v1536_v35, %v1520_v52 }
 0x523   : > { %v1524_v25 = vpop.f32.mrf.mxu1 }
 0x524   : > { %1561 = vst [vmem:[%s2769_s10] sm:$0xff] %v1553_v18  ;;  %1563 = vst [vmem:[%s2769_s10 + $0x10] sm:$0xff] %v1555_v63  ;;  %v1554_v15 = vadd.f32 %v1546_v28, %v1538_v56  ;;  %v1556_v47 = vadd.f32 %v1548_v27, %v1540_v13  ;;  %v1541_v48 = vmul.f32 %v1536_v35, %v1524_v25 }
 0x525   : > { %v1526_v39 = vpop.f32.mrf.mxu1 }
 0x526   : > { %1562 = vst [vmem:[%s2769_s10 + $0x8] sm:$0xff] %v1554_v15  ;;  %1564 = vst [vmem:[%s2769_s10 + $0x18] sm:$0xff] %v1556_v47  ;;  %v1557_v61 = vadd.f32 %v1549_v20, %v1541_v48  ;;  %v1542_v29 = vmul.f32 %v1536_v35, %v1526_v39 }
 0x527   : > { %v1530_v31 = vpop.f32.mrf.mxu1 }
 0x528   : > { %1565 = vst [vmem:[%s2769_s10 + $0x20] sm:$0xff] %v1557_v61  ;;  %v1558_v44 = vadd.f32 %v1550_v11, %v1542_v29  ;;  %v1543_v3 = vmul.f32 %v1536_v35, %v1530_v31 }
 0x529   : > { %v1532_v45 = vpop.f32.mrf.mxu1 }
 0x52a   : > { %1566 = vst [vmem:[%s2769_s10 + $0x28] sm:$0xff] %v1558_v44  ;;  %v1559_v50 = vadd.f32 %v1551_v34, %v1543_v3  ;;  %v1544_v41 = vmul.f32 %v1536_v35, %v1532_v45 }
 0x52c   : > { %1567 = vst [vmem:[%s2769_s10 + $0x30] sm:$0xff] %v1559_v50  ;;  %v1560_v37 = vadd.f32 %v1552_v0, %v1544_v41 }
 0x52e   : > { %1568 = vst [vmem:[%s2769_s10 + $0x38] sm:$0xff] %v1560_v37 }
 0x52f PF: > { %s16_s22 = sadd.s32 1, %s2030_s22   ;;  %s2890_s20 = smov %s2026_s21 }
 0x530   : > { %p13_p5 = scmp.ge.s32.totalorder %s16_s22, 4   ;;  %s2891_s21 = smov %s2893_s4 }
 0x532   :  { %15 = sbr.rel (!%p13_p5) target bundleno = 2 (0x2), region = 78 }

</bundles_post_ra>
